<compile_context>
chip_gen: v5e
topology: v5e:2x2
jax: 0.10.0
libtpu: 0.0.40
codegen_flags: <defaults>
</compile_context>

<pallas_src>
import math

import jax
import jax.numpy as jnp
from jax.experimental import pallas as pl
from jax.experimental.pallas import tpu as pltpu

# ---- model config (synthetic small BERT) ------------------------------------
VOCAB = 64
MAX_LEN = 8          # L
HIDDEN = 32          # H (emb_dim)
INTERMEDIATE = 64    # I
NUM_HEADS = 2
HEAD_DIM = HIDDEN // NUM_HEADS
LN_EPS = 1e-12

TN_MAX = 256         # max sequences per grid step (raise to 512 on 1-TC v5e/v6e)
MIN_GRID = 2         # prefer >= 2 grid steps so v7x's two TensorCores both work


def _round_up(x, m):
    return ((x + m - 1) // m) * m


def _layernorm(x, g, b, eps=LN_EPS):
    mu = jnp.mean(x, axis=-1, keepdims=True)
    var = jnp.mean((x - mu) ** 2, axis=-1, keepdims=True)
    return (x - mu) * jax.lax.rsqrt(var + eps) * g + b


def _encoder_kernel(ids_ref, mask_ref,
                    wemb_ref, pemb_ref,
                    lne_g_ref, lne_b_ref,
                    wqkv_ref, bqkv_ref,
                    wo_ref, bo_ref, ln1_g_ref, ln1_b_ref,
                    w1_ref, b1_ref, w2_ref, b2_ref,
                    ln2_g_ref, ln2_b_ref,
                    o_ref):
    # Per grid step: TN sequences of L tokens each.
    TN, L = mask_ref.shape
    H = HIDDEN
    M = TN * L

    # ---- fused embedding lookup: one-hot (M, V) @ (V, H) on the MXU ----------
    ids = ids_ref[...]                                             # (TN, L) int32
    vocab_iota = jax.lax.broadcasted_iota(jnp.int32, (TN, L, VOCAB), 2)
    onehot = (ids[:, :, None] == vocab_iota).astype(jnp.bfloat16)  # (TN, L, V)
    onehot = onehot.reshape(M, VOCAB)          # leading-dim merge (layout-preserving)
    x = jnp.dot(onehot, wemb_ref[...],
                preferred_element_type=jnp.float32)                # (M, H) f32
    # Positional embeddings (leading-dim split/merge reshapes are layout-preserving).
    x = x.reshape(TN, L, H) + pemb_ref[...][None, :, :]
    x = x.reshape(M, H)

    # Embedding LayerNorm (as in BERT embeddings module) — f32 math.
    x = _layernorm(x, lne_g_ref[...], lne_b_ref[...])

    # ---- fused QKV projection (bf16 operands, f32 accumulate) ----------------
    # 1/sqrt(head_dim) pre-folded into the Q slice of the weights/bias.
    qkv = jnp.dot(x.astype(jnp.bfloat16), wqkv_ref[...],
                  preferred_element_type=jnp.float32) + bqkv_ref[...]   # (M, 3H)
    q = qkv[:, 0 * H:1 * H].reshape(TN, L, H)
    k = qkv[:, 1 * H:2 * H].reshape(TN, L, H)
    v = qkv[:, 2 * H:3 * H].reshape(TN, L, H)

    # Additive key mask, computed once per block: (TN, 1, L).
    neg = ((1.0 - mask_ref[...]) * -1e9)[:, None, :]

    # ---- multi-head attention, batched over the TN sequence axis -------------
    # TODO(synk): a single head-batched einsum ('nqhd,nkhd->nhqk') requires a
    # dot_general with two batch dims, unsupported by the Mosaic lowering;
    # heads stay a static 2-iteration unroll (f32 — MXU has plenty of slack).
    ctx_heads = []
    for h in range(NUM_HEADS):
        sl = slice(h * HEAD_DIM, (h + 1) * HEAD_DIM)
        qh, kh, vh = q[..., sl], k[..., sl], v[..., sl]
        s = jnp.einsum('nqd,nkd->nqk', qh, kh,
                       preferred_element_type=jnp.float32)      # (TN, L, L)
        s = s + neg
        s = s - jnp.max(s, axis=-1, keepdims=True)              # stable softmax
        p = jnp.exp(s)
        p = p * pl.reciprocal(jnp.sum(p, axis=-1, keepdims=True), approx=True)
        ctx_heads.append(jnp.einsum('nqk,nkd->nqd', p, vh,
                                    preferred_element_type=jnp.float32))
    ctx = jnp.concatenate(ctx_heads, axis=-1).reshape(M, H)

    # Attention output projection + residual + LayerNorm.
    attn = jnp.dot(ctx.astype(jnp.bfloat16), wo_ref[...],
                   preferred_element_type=jnp.float32) + bo_ref[...]
    x1 = _layernorm(x + attn, ln1_g_ref[...], ln1_b_ref[...])

    # Feed-forward (GELU) + residual + LayerNorm.
    h1 = jnp.dot(x1.astype(jnp.bfloat16), w1_ref[...],
                 preferred_element_type=jnp.float32) + b1_ref[...]
    # TODO(synk): HF BERT uses the exact erf GELU; tanh approximation used here.
    h1 = jax.nn.gelu(h1, approximate=True)
    h2 = jnp.dot(h1.astype(jnp.bfloat16), w2_ref[...],
                 preferred_element_type=jnp.float32) + b2_ref[...]
    out = _layernorm(x1 + h2, ln2_g_ref[...], ln2_b_ref[...])           # (M, H)

    # ---- lane-dense output slab: (TN, L*H) = (TN, 256) ------------------------
    # Built from static sublane slices + one lane concat (relayout on XLU/VPU,
    # which has slack here) so the store is a full-width vst, not 32-lane masked.
    out3 = out.reshape(TN, L, H)                     # leading-dim split only
    slab = jnp.concatenate([out3[:, l, :] for l in range(L)], axis=-1)  # (TN, L*H)
    o_ref[...] = slab.astype(o_ref.dtype)


def _full_spec(shape):
    # Whole-array (grid-invariant) parameter spec — stays resident in VMEM.
    zeros = (0,) * len(shape)
    return pl.BlockSpec(shape, lambda i, _z=zeros: _z)


_PARAM_ORDER = [
    "word_emb", "pos_emb",
    "lne_g", "lne_b",
    "w_qkv", "b_qkv",
    "wo", "bo", "ln1_g", "ln1_b",
    "w1", "b1", "w2", "b2",
    "ln2_g", "ln2_b",
]


def _choose_tn(n, tn_max=TN_MAX, min_grid=MIN_GRID):
    """Balanced sequences-per-step: padding waste < 8 seqs, grid >= 2 when possible."""
    blocks = pl.cdiv(n, tn_max)
    if n >= 8 * min_grid:
        blocks = max(blocks, min_grid)      # keep both v7x TensorCores busy
    return _round_up(pl.cdiv(n, blocks), 8)


def _cost_estimate(n_pad, param_vals):
    m = n_pad * MAX_LEN                      # total tokens
    flops = (2 * m * VOCAB * HIDDEN                       # embedding gather matmul
             + 2 * m * HIDDEN * 3 * HIDDEN                # fused QKV
             + 4 * NUM_HEADS * m * MAX_LEN * HEAD_DIM     # attention scores + ctx
             + 2 * m * HIDDEN * HIDDEN                    # output projection
             + 4 * m * HIDDEN * INTERMEDIATE)             # FFN
    transcendentals = (NUM_HEADS * m * MAX_LEN            # softmax exp
                       + m * INTERMEDIATE                 # gelu tanh
                       + 3 * m + NUM_HEADS * m)           # LN rsqrt + softmax recip
    bytes_accessed = (2 * 4 * n_pad * MAX_LEN             # ids + mask
                      + 4 * n_pad * MAX_LEN * HIDDEN      # output
                      + sum(int(p.size) * p.dtype.itemsize for p in param_vals))
    return pl.CostEstimate(flops=int(flops),
                           transcendentals=int(transcendentals),
                           bytes_accessed=int(bytes_accessed))


def bert_encoder_layer(ids_flat, mask_flat, params, *, tn_max=TN_MAX):
    """ids_flat: (N, L) int32, mask_flat: (N, L) f32 in {0,1}.

    Returns (N, L, H) f32 last_hidden_state.
    """
    N, L = ids_flat.shape
    H = HIDDEN

    TN = _choose_tn(N, tn_max)
    N_pad = _round_up(N, TN)
    if N_pad != N:
        ids_flat = jnp.pad(ids_flat, ((0, N_pad - N), (0, 0)))
        mask_flat = jnp.pad(mask_flat, ((0, N_pad - N), (0, 0)))

    grid = (N_pad // TN,)
    param_vals = [params[k] for k in _PARAM_ORDER]

    in_specs = [
        pl.BlockSpec((TN, L), lambda i: (i, 0)),   # token ids (TN, L) — lane-light
        pl.BlockSpec((TN, L), lambda i: (i, 0)),   # attention mask
    ] + [_full_spec(p.shape) for p in param_vals]

    out = pl.pallas_call(
        _encoder_kernel,
        out_shape=jax.ShapeDtypeStruct((N_pad, L * H), jnp.float32),
        grid=grid,
        in_specs=in_specs,
        out_specs=pl.BlockSpec((TN, L * H), lambda i: (i, 0)),   # lane-dense slab
        compiler_params=pltpu.CompilerParams(
            dimension_semantics=("parallel",)),
        cost_estimate=_cost_estimate(N_pad, param_vals),
    )(ids_flat, mask_flat, *param_vals)

    return out[:N].reshape(N, L, H)


def init_params(key):
    """Deterministic synthetic BERT-layer parameters.

    Q/K/V are fused into one (H, 3H) weight; the 1/sqrt(head_dim) attention
    scale is folded into the Q slice once, here.  MXU weight matrices are
    stored in bf16 (f32 accumulation happens in the kernel); biases / LN
    params / positional embeddings stay f32 (all elementwise math is f32).
    """
    ks = jax.random.split(key, 8)
    s = 0.02
    scale = 1.0 / math.sqrt(HEAD_DIM)

    wq = jax.random.normal(ks[2], (HIDDEN, HIDDEN), jnp.float32) * s
    wk = jax.random.normal(ks[3], (HIDDEN, HIDDEN), jnp.float32) * s
    wv = jax.random.normal(ks[4], (HIDDEN, HIDDEN), jnp.float32) * s

    p = {
        "word_emb": (jax.random.normal(ks[0], (VOCAB, HIDDEN), jnp.float32) * s
                     ).astype(jnp.bfloat16),
        "pos_emb": jax.random.normal(ks[1], (MAX_LEN, HIDDEN), jnp.float32) * s,
        "lne_g": jnp.ones((1, HIDDEN), jnp.float32),
        "lne_b": jnp.zeros((1, HIDDEN), jnp.float32),
        "w_qkv": jnp.concatenate([wq * scale, wk, wv], axis=1).astype(jnp.bfloat16),
        "b_qkv": jnp.zeros((1, 3 * HIDDEN), jnp.float32),
        "wo": (jax.random.normal(ks[5], (HIDDEN, HIDDEN), jnp.float32) * s
               ).astype(jnp.bfloat16),
        "bo": jnp.zeros((1, HIDDEN), jnp.float32),
        "ln1_g": jnp.ones((1, HIDDEN), jnp.float32),
        "ln1_b": jnp.zeros((1, HIDDEN), jnp.float32),
        "w1": (jax.random.normal(ks[6], (HIDDEN, INTERMEDIATE), jnp.float32) * s
               ).astype(jnp.bfloat16),
        "b1": jnp.zeros((1, INTERMEDIATE), jnp.float32),
        "w2": (jax.random.normal(ks[7], (INTERMEDIATE, HIDDEN), jnp.float32) * s
               ).astype(jnp.bfloat16),
        "b2": jnp.zeros((1, HIDDEN), jnp.float32),
        "ln2_g": jnp.ones((1, HIDDEN), jnp.float32),
        "ln2_b": jnp.zeros((1, HIDDEN), jnp.float32),
    }
    return p


def cell_encoder_forward(input_ids, attention_masks, params):
    """Mirror of CellEncoder.forward.

    input_ids:       (B, C, L) int32
    attention_masks: (B, C, L) in {0, 1}
    returns:         (B, C, L, H) float32 (last_hidden_state per token)
    """
    B, C, L = input_ids.shape
    ids_flat = input_ids.reshape(-1, L)                          # (N, L)
    mask_flat = attention_masks.reshape(-1, L).astype(jnp.float32)
    tokens = bert_encoder_layer(ids_flat, mask_flat, params)     # (N, L, H)
    return tokens.reshape(B, C, L, HIDDEN)


if __name__ == "__main__":
    key = jax.random.PRNGKey(0)
    k_param, k_ids, k_len = jax.random.split(key, 3)

    params = init_params(k_param)

    B, C, L = 2, 4, MAX_LEN
    input_ids = jax.random.randint(k_ids, (B, C, L), 0, VOCAB, dtype=jnp.int32)
    # Variable-length sequences -> 0/1 attention masks (deterministic).
    lengths = jax.random.randint(k_len, (B, C), 1, L + 1, dtype=jnp.int32)
    attention_masks = (jnp.arange(L)[None, None, :] < lengths[:, :, None]).astype(jnp.int32)

    out = cell_encoder_forward(input_ids, attention_masks, params)
    out = jax.block_until_ready(out)

    assert out.shape == (B, C, L, HIDDEN), out.shape
    assert bool(jnp.all(jnp.isfinite(out)))
    print("KERNEL_OK")
</pallas_src>

<mosaic_0001>
module attributes {stable_mosaic.version = 11 : i64} {
  func.func @_encoder_kernel(%arg0: i32, %arg1: memref<8x8xi32, #tpu.memory_space<vmem>>, %arg2: memref<8x8xf32, #tpu.memory_space<vmem>>, %arg3: memref<64x32xbf16, #tpu.memory_space<vmem>>, %arg4: memref<8x32xf32, #tpu.memory_space<vmem>>, %arg5: memref<1x32xf32, #tpu.memory_space<vmem>>, %arg6: memref<1x32xf32, #tpu.memory_space<vmem>>, %arg7: memref<32x96xbf16, #tpu.memory_space<vmem>>, %arg8: memref<1x96xf32, #tpu.memory_space<vmem>>, %arg9: memref<32x32xbf16, #tpu.memory_space<vmem>>, %arg10: memref<1x32xf32, #tpu.memory_space<vmem>>, %arg11: memref<1x32xf32, #tpu.memory_space<vmem>>, %arg12: memref<1x32xf32, #tpu.memory_space<vmem>>, %arg13: memref<32x64xbf16, #tpu.memory_space<vmem>>, %arg14: memref<1x64xf32, #tpu.memory_space<vmem>>, %arg15: memref<64x32xbf16, #tpu.memory_space<vmem>>, %arg16: memref<1x32xf32, #tpu.memory_space<vmem>>, %arg17: memref<1x32xf32, #tpu.memory_space<vmem>>, %arg18: memref<1x32xf32, #tpu.memory_space<vmem>>, %arg19: memref<8x256xf32, #tpu.memory_space<vmem>>) attributes {dimension_semantics = [#tpu.dimension_semantics<parallel>], iteration_bounds = array<i64: 1>, scalar_prefetch = 0 : i64, scratch_operands = 0 : i64, tpu.core_type = #tpu.core_type<tc>, window_params = [{transform_indices = @transform_0, window_bounds = array<i64: 8, 8>}, {transform_indices = @transform_1, window_bounds = array<i64: 8, 8>}, {pipeline_mode = #tpu.pipeline_mode<synchronous>, transform_indices = @transform_2, window_bounds = array<i64: 64, 32>}, {pipeline_mode = #tpu.pipeline_mode<synchronous>, transform_indices = @transform_3, window_bounds = array<i64: 8, 32>}, {pipeline_mode = #tpu.pipeline_mode<synchronous>, transform_indices = @transform_4, window_bounds = array<i64: 1, 32>}, {pipeline_mode = #tpu.pipeline_mode<synchronous>, transform_indices = @transform_5, window_bounds = array<i64: 1, 32>}, {pipeline_mode = #tpu.pipeline_mode<synchronous>, transform_indices = @transform_6, window_bounds = array<i64: 32, 96>}, {pipeline_mode = #tpu.pipeline_mode<synchronous>, transform_indices = @transform_7, window_bounds = array<i64: 1, 96>}, {pipeline_mode = #tpu.pipeline_mode<synchronous>, transform_indices = @transform_8, window_bounds = array<i64: 32, 32>}, {pipeline_mode = #tpu.pipeline_mode<synchronous>, transform_indices = @transform_9, window_bounds = array<i64: 1, 32>}, {pipeline_mode = #tpu.pipeline_mode<synchronous>, transform_indices = @transform_10, window_bounds = array<i64: 1, 32>}, {pipeline_mode = #tpu.pipeline_mode<synchronous>, transform_indices = @transform_11, window_bounds = array<i64: 1, 32>}, {pipeline_mode = #tpu.pipeline_mode<synchronous>, transform_indices = @transform_12, window_bounds = array<i64: 32, 64>}, {pipeline_mode = #tpu.pipeline_mode<synchronous>, transform_indices = @transform_13, window_bounds = array<i64: 1, 64>}, {pipeline_mode = #tpu.pipeline_mode<synchronous>, transform_indices = @transform_14, window_bounds = array<i64: 64, 32>}, {pipeline_mode = #tpu.pipeline_mode<synchronous>, transform_indices = @transform_15, window_bounds = array<i64: 1, 32>}, {pipeline_mode = #tpu.pipeline_mode<synchronous>, transform_indices = @transform_16, window_bounds = array<i64: 1, 32>}, {pipeline_mode = #tpu.pipeline_mode<synchronous>, transform_indices = @transform_17, window_bounds = array<i64: 1, 32>}, {transform_indices = @transform_18, window_bounds = array<i64: 8, 256>}]} {
    %c0 = arith.constant 0 : index
    %c0_0 = arith.constant 0 : index
    %0 = vector.load %arg1[%c0, %c0_0] : memref<8x8xi32, #tpu.memory_space<vmem>>, vector<8x8xi32>
    %1 = tpu.iota {dimensions = array<i32: 2>} : vector<8x8x64xi32>
    %2 = vector.shape_cast %0 : vector<8x8xi32> to vector<8x8x1xi32>
    %3 = vector.broadcast %2 : vector<8x8x1xi32> to vector<8x8x64xi32>
    %4 = arith.cmpi eq, %3, %1 : vector<8x8x64xi32>
    %5 = arith.extui %4 : vector<8x8x64xi1> to vector<8x8x64xi32>
    %6 = arith.sitofp %5 : vector<8x8x64xi32> to vector<8x8x64xf32>
    %7 = arith.truncf %6 : vector<8x8x64xf32> to vector<8x8x64xbf16>
    %8 = vector.shape_cast %7 : vector<8x8x64xbf16> to vector<64x64xbf16>
    %c0_1 = arith.constant 0 : index
    %c0_2 = arith.constant 0 : index
    %9 = vector.load %arg3[%c0_1, %c0_2] : memref<64x32xbf16, #tpu.memory_space<vmem>>, vector<64x32xbf16>
    %cst = arith.constant dense<0.000000e+00> : vector<64x32xf32>
    %10 = tpu.matmul %8, %9, %cst {dimension_numbers = #tpu.dot_dimension_numbers<[1], [0], [0], [1], [0, 0, 1, 1], [], []>} : vector<64x64xbf16>, vector<64x32xbf16>, vector<64x32xf32> -> vector<64x32xf32>
    %11 = vector.shape_cast %10 : vector<64x32xf32> to vector<8x8x32xf32>
    %c0_3 = arith.constant 0 : index
    %c0_4 = arith.constant 0 : index
    %12 = vector.load %arg4[%c0_3, %c0_4] : memref<8x32xf32, #tpu.memory_space<vmem>>, vector<8x32xf32>
    %13 = vector.shape_cast %12 : vector<8x32xf32> to vector<1x8x32xf32>
    %14 = vector.broadcast %13 : vector<1x8x32xf32> to vector<8x8x32xf32>
    %15 = arith.addf %11, %14 : vector<8x8x32xf32>
    %16 = vector.shape_cast %15 : vector<8x8x32xf32> to vector<64x32xf32>
    %c0_5 = arith.constant 0 : index
    %c0_6 = arith.constant 0 : index
    %17 = vector.load %arg5[%c0_5, %c0_6] : memref<1x32xf32, #tpu.memory_space<vmem>>, vector<1x32xf32>
    %c0_7 = arith.constant 0 : index
    %c0_8 = arith.constant 0 : index
    %18 = vector.load %arg6[%c0_7, %c0_8] : memref<1x32xf32, #tpu.memory_space<vmem>>, vector<1x32xf32>
    %cst_9 = arith.constant dense<0.000000e+00> : vector<64xf32>
    %19 = vector.multi_reduction <add>, %16, %cst_9 [1] : vector<64x32xf32> to vector<64xf32>
    %20 = vector.shape_cast %19 : vector<64xf32> to vector<64x1xf32>
    %cst_10 = arith.constant 3.200000e+01 : f32
    %21 = vector.broadcast %cst_10 : f32 to vector<64x1xf32>
    %22 = arith.divf %20, %21 : vector<64x1xf32>
    %23 = vector.broadcast %22 : vector<64x1xf32> to vector<64x32xf32>
    %24 = arith.subf %16, %23 : vector<64x32xf32>
    %25 = arith.mulf %24, %24 : vector<64x32xf32>
    %cst_11 = arith.constant dense<0.000000e+00> : vector<64xf32>
    %26 = vector.multi_reduction <add>, %25, %cst_11 [1] : vector<64x32xf32> to vector<64xf32>
    %27 = vector.shape_cast %26 : vector<64xf32> to vector<64x1xf32>
    %cst_12 = arith.constant 3.200000e+01 : f32
    %28 = vector.broadcast %cst_12 : f32 to vector<64x1xf32>
    %29 = arith.divf %27, %28 : vector<64x1xf32>
    %30 = vector.broadcast %22 : vector<64x1xf32> to vector<64x32xf32>
    %31 = arith.subf %16, %30 : vector<64x32xf32>
    %cst_13 = arith.constant 9.99999996E-13 : f32
    %32 = vector.broadcast %cst_13 : f32 to vector<64x1xf32>
    %33 = arith.addf %29, %32 : vector<64x1xf32>
    %34 = math.rsqrt %33 : vector<64x1xf32>
    %35 = vector.broadcast %34 : vector<64x1xf32> to vector<64x32xf32>
    %36 = arith.mulf %31, %35 : vector<64x32xf32>
    %37 = vector.broadcast %17 : vector<1x32xf32> to vector<64x32xf32>
    %38 = arith.mulf %36, %37 : vector<64x32xf32>
    %39 = vector.broadcast %18 : vector<1x32xf32> to vector<64x32xf32>
    %40 = arith.addf %38, %39 : vector<64x32xf32>
    %41 = arith.truncf %40 : vector<64x32xf32> to vector<64x32xbf16>
    %c0_14 = arith.constant 0 : index
    %c0_15 = arith.constant 0 : index
    %42 = vector.load %arg7[%c0_14, %c0_15] : memref<32x96xbf16, #tpu.memory_space<vmem>>, vector<32x96xbf16>
    %cst_16 = arith.constant dense<0.000000e+00> : vector<64x96xf32>
    %43 = tpu.matmul %41, %42, %cst_16 {dimension_numbers = #tpu.dot_dimension_numbers<[1], [0], [0], [1], [0, 0, 1, 1], [], []>} : vector<64x32xbf16>, vector<32x96xbf16>, vector<64x96xf32> -> vector<64x96xf32>
    %c0_17 = arith.constant 0 : index
    %c0_18 = arith.constant 0 : index
    %44 = vector.load %arg8[%c0_17, %c0_18] : memref<1x96xf32, #tpu.memory_space<vmem>>, vector<1x96xf32>
    %45 = vector.broadcast %44 : vector<1x96xf32> to vector<64x96xf32>
    %46 = arith.addf %43, %45 : vector<64x96xf32>
    %47 = vector.extract_strided_slice %46 {offsets = [0, 0], sizes = [64, 32], strides = [1, 1]} : vector<64x96xf32> to vector<64x32xf32>
    %48 = vector.shape_cast %47 : vector<64x32xf32> to vector<8x8x32xf32>
    %49 = vector.extract_strided_slice %46 {offsets = [0, 32], sizes = [64, 32], strides = [1, 1]} : vector<64x96xf32> to vector<64x32xf32>
    %50 = vector.shape_cast %49 : vector<64x32xf32> to vector<8x8x32xf32>
    %51 = vector.extract_strided_slice %46 {offsets = [0, 64], sizes = [64, 32], strides = [1, 1]} : vector<64x96xf32> to vector<64x32xf32>
    %52 = vector.shape_cast %51 : vector<64x32xf32> to vector<8x8x32xf32>
    %c0_19 = arith.constant 0 : index
    %c0_20 = arith.constant 0 : index
    %53 = vector.load %arg2[%c0_19, %c0_20] : memref<8x8xf32, #tpu.memory_space<vmem>>, vector<8x8xf32>
    %cst_21 = arith.constant 1.000000e+00 : f32
    %54 = vector.broadcast %cst_21 : f32 to vector<8x8xf32>
    %55 = arith.subf %54, %53 : vector<8x8xf32>
    %cst_22 = arith.constant -1.000000e+09 : f32
    %56 = vector.broadcast %cst_22 : f32 to vector<8x8xf32>
    %57 = arith.mulf %55, %56 : vector<8x8xf32>
    %58 = vector.shape_cast %57 : vector<8x8xf32> to vector<8x1x8xf32>
    %59 = vector.extract_strided_slice %48 {offsets = [0, 0, 0], sizes = [8, 8, 16], strides = [1, 1, 1]} : vector<8x8x32xf32> to vector<8x8x16xf32>
    %60 = vector.extract_strided_slice %50 {offsets = [0, 0, 0], sizes = [8, 8, 16], strides = [1, 1, 1]} : vector<8x8x32xf32> to vector<8x8x16xf32>
    %61 = vector.extract_strided_slice %52 {offsets = [0, 0, 0], sizes = [8, 8, 16], strides = [1, 1, 1]} : vector<8x8x32xf32> to vector<8x8x16xf32>
    "tpu.trace_start"() <{level = 10 : i32, message = "nqd,nkd->nqk"}> : () -> ()
    %cst_23 = arith.constant dense<0.000000e+00> : vector<8x8x8xf32>
    %62 = tpu.matmul %59, %60, %cst_23 {dimension_numbers = #tpu.dot_dimension_numbers<[2], [2], [1], [1], [0, 0, 0, 1, 1, 1], [0], [0]>} : vector<8x8x16xf32>, vector<8x8x16xf32>, vector<8x8x8xf32> -> vector<8x8x8xf32>
    "tpu.trace_stop"() : () -> ()
    %63 = vector.broadcast %58 : vector<8x1x8xf32> to vector<8x8x8xf32>
    %64 = arith.addf %62, %63 : vector<8x8x8xf32>
    %cst_24 = arith.constant dense<0xFF800000> : vector<8x8xf32>
    %65 = vector.multi_reduction <maximumf>, %64, %cst_24 [2] : vector<8x8x8xf32> to vector<8x8xf32>
    %66 = vector.shape_cast %65 : vector<8x8xf32> to vector<8x8x1xf32>
    %67 = vector.broadcast %66 : vector<8x8x1xf32> to vector<8x8x8xf32>
    %68 = arith.subf %64, %67 : vector<8x8x8xf32>
    %69 = math.exp %68 : vector<8x8x8xf32>
    %cst_25 = arith.constant dense<0.000000e+00> : vector<8x8xf32>
    %70 = vector.multi_reduction <add>, %69, %cst_25 [2] : vector<8x8x8xf32> to vector<8x8xf32>
    %71 = vector.shape_cast %70 : vector<8x8xf32> to vector<8x8x1xf32>
    %72 = tpu.reciprocal %71 {approx = true} : vector<8x8x1xf32> -> vector<8x8x1xf32>
    %73 = vector.broadcast %72 : vector<8x8x1xf32> to vector<8x8x8xf32>
    %74 = arith.mulf %69, %73 : vector<8x8x8xf32>
    "tpu.trace_start"() <{level = 10 : i32, message = "nqk,nkd->nqd"}> : () -> ()
    %cst_26 = arith.constant dense<0.000000e+00> : vector<8x8x16xf32>
    %75 = tpu.matmul %74, %61, %cst_26 {dimension_numbers = #tpu.dot_dimension_numbers<[2], [1], [1], [2], [0, 0, 0, 1, 1, 2], [0], [0]>} : vector<8x8x8xf32>, vector<8x8x16xf32>, vector<8x8x16xf32> -> vector<8x8x16xf32>
    "tpu.trace_stop"() : () -> ()
    %76 = vector.extract_strided_slice %48 {offsets = [0, 0, 16], sizes = [8, 8, 16], strides = [1, 1, 1]} : vector<8x8x32xf32> to vector<8x8x16xf32>
    %77 = vector.extract_strided_slice %50 {offsets = [0, 0, 16], sizes = [8, 8, 16], strides = [1, 1, 1]} : vector<8x8x32xf32> to vector<8x8x16xf32>
    %78 = vector.extract_strided_slice %52 {offsets = [0, 0, 16], sizes = [8, 8, 16], strides = [1, 1, 1]} : vector<8x8x32xf32> to vector<8x8x16xf32>
    "tpu.trace_start"() <{level = 10 : i32, message = "nqd,nkd->nqk"}> : () -> ()
    %cst_27 = arith.constant dense<0.000000e+00> : vector<8x8x8xf32>
    %79 = tpu.matmul %76, %77, %cst_27 {dimension_numbers = #tpu.dot_dimension_numbers<[2], [2], [1], [1], [0, 0, 0, 1, 1, 1], [0], [0]>} : vector<8x8x16xf32>, vector<8x8x16xf32>, vector<8x8x8xf32> -> vector<8x8x8xf32>
    "tpu.trace_stop"() : () -> ()
    %80 = vector.broadcast %58 : vector<8x1x8xf32> to vector<8x8x8xf32>
    %81 = arith.addf %79, %80 : vector<8x8x8xf32>
    %cst_28 = arith.constant dense<0xFF800000> : vector<8x8xf32>
    %82 = vector.multi_reduction <maximumf>, %81, %cst_28 [2] : vector<8x8x8xf32> to vector<8x8xf32>
    %83 = vector.shape_cast %82 : vector<8x8xf32> to vector<8x8x1xf32>
    %84 = vector.broadcast %83 : vector<8x8x1xf32> to vector<8x8x8xf32>
    %85 = arith.subf %81, %84 : vector<8x8x8xf32>
    %86 = math.exp %85 : vector<8x8x8xf32>
    %cst_29 = arith.constant dense<0.000000e+00> : vector<8x8xf32>
    %87 = vector.multi_reduction <add>, %86, %cst_29 [2] : vector<8x8x8xf32> to vector<8x8xf32>
    %88 = vector.shape_cast %87 : vector<8x8xf32> to vector<8x8x1xf32>
    %89 = tpu.reciprocal %88 {approx = true} : vector<8x8x1xf32> -> vector<8x8x1xf32>
    %90 = vector.broadcast %89 : vector<8x8x1xf32> to vector<8x8x8xf32>
    %91 = arith.mulf %86, %90 : vector<8x8x8xf32>
    "tpu.trace_start"() <{level = 10 : i32, message = "nqk,nkd->nqd"}> : () -> ()
    %cst_30 = arith.constant dense<0.000000e+00> : vector<8x8x16xf32>
    %92 = tpu.matmul %91, %78, %cst_30 {dimension_numbers = #tpu.dot_dimension_numbers<[2], [1], [1], [2], [0, 0, 0, 1, 1, 2], [0], [0]>} : vector<8x8x8xf32>, vector<8x8x16xf32>, vector<8x8x16xf32> -> vector<8x8x16xf32>
    "tpu.trace_stop"() : () -> ()
    %93 = tpu.concatenate %75, %92 in 2 : vector<8x8x16xf32>, vector<8x8x16xf32> -> vector<8x8x32xf32>
    %94 = vector.shape_cast %93 : vector<8x8x32xf32> to vector<64x32xf32>
    %95 = arith.truncf %94 : vector<64x32xf32> to vector<64x32xbf16>
    %c0_31 = arith.constant 0 : index
    %c0_32 = arith.constant 0 : index
    %96 = vector.load %arg9[%c0_31, %c0_32] : memref<32x32xbf16, #tpu.memory_space<vmem>>, vector<32x32xbf16>
    %cst_33 = arith.constant dense<0.000000e+00> : vector<64x32xf32>
    %97 = tpu.matmul %95, %96, %cst_33 {dimension_numbers = #tpu.dot_dimension_numbers<[1], [0], [0], [1], [0, 0, 1, 1], [], []>} : vector<64x32xbf16>, vector<32x32xbf16>, vector<64x32xf32> -> vector<64x32xf32>
    %c0_34 = arith.constant 0 : index
    %c0_35 = arith.constant 0 : index
    %98 = vector.load %arg10[%c0_34, %c0_35] : memref<1x32xf32, #tpu.memory_space<vmem>>, vector<1x32xf32>
    %99 = vector.broadcast %98 : vector<1x32xf32> to vector<64x32xf32>
    %100 = arith.addf %97, %99 : vector<64x32xf32>
    %101 = arith.addf %40, %100 : vector<64x32xf32>
    %c0_36 = arith.constant 0 : index
    %c0_37 = arith.constant 0 : index
    %102 = vector.load %arg11[%c0_36, %c0_37] : memref<1x32xf32, #tpu.memory_space<vmem>>, vector<1x32xf32>
    %c0_38 = arith.constant 0 : index
    %c0_39 = arith.constant 0 : index
    %103 = vector.load %arg12[%c0_38, %c0_39] : memref<1x32xf32, #tpu.memory_space<vmem>>, vector<1x32xf32>
    %cst_40 = arith.constant dense<0.000000e+00> : vector<64xf32>
    %104 = vector.multi_reduction <add>, %101, %cst_40 [1] : vector<64x32xf32> to vector<64xf32>
    %105 = vector.shape_cast %104 : vector<64xf32> to vector<64x1xf32>
    %cst_41 = arith.constant 3.200000e+01 : f32
    %106 = vector.broadcast %cst_41 : f32 to vector<64x1xf32>
    %107 = arith.divf %105, %106 : vector<64x1xf32>
    %108 = vector.broadcast %107 : vector<64x1xf32> to vector<64x32xf32>
    %109 = arith.subf %101, %108 : vector<64x32xf32>
    %110 = arith.mulf %109, %109 : vector<64x32xf32>
    %cst_42 = arith.constant dense<0.000000e+00> : vector<64xf32>
    %111 = vector.multi_reduction <add>, %110, %cst_42 [1] : vector<64x32xf32> to vector<64xf32>
    %112 = vector.shape_cast %111 : vector<64xf32> to vector<64x1xf32>
    %cst_43 = arith.constant 3.200000e+01 : f32
    %113 = vector.broadcast %cst_43 : f32 to vector<64x1xf32>
    %114 = arith.divf %112, %113 : vector<64x1xf32>
    %115 = vector.broadcast %107 : vector<64x1xf32> to vector<64x32xf32>
    %116 = arith.subf %101, %115 : vector<64x32xf32>
    %cst_44 = arith.constant 9.99999996E-13 : f32
    %117 = vector.broadcast %cst_44 : f32 to vector<64x1xf32>
    %118 = arith.addf %114, %117 : vector<64x1xf32>
    %119 = math.rsqrt %118 : vector<64x1xf32>
    %120 = vector.broadcast %119 : vector<64x1xf32> to vector<64x32xf32>
    %121 = arith.mulf %116, %120 : vector<64x32xf32>
    %122 = vector.broadcast %102 : vector<1x32xf32> to vector<64x32xf32>
    %123 = arith.mulf %121, %122 : vector<64x32xf32>
    %124 = vector.broadcast %103 : vector<1x32xf32> to vector<64x32xf32>
    %125 = arith.addf %123, %124 : vector<64x32xf32>
    %126 = arith.truncf %125 : vector<64x32xf32> to vector<64x32xbf16>
    %c0_45 = arith.constant 0 : index
    %c0_46 = arith.constant 0 : index
    %127 = vector.load %arg13[%c0_45, %c0_46] : memref<32x64xbf16, #tpu.memory_space<vmem>>, vector<32x64xbf16>
    %cst_47 = arith.constant dense<0.000000e+00> : vector<64x64xf32>
    %128 = tpu.matmul %126, %127, %cst_47 {dimension_numbers = #tpu.dot_dimension_numbers<[1], [0], [0], [1], [0, 0, 1, 1], [], []>} : vector<64x32xbf16>, vector<32x64xbf16>, vector<64x64xf32> -> vector<64x64xf32>
    %c0_48 = arith.constant 0 : index
    %c0_49 = arith.constant 0 : index
    %129 = vector.load %arg14[%c0_48, %c0_49] : memref<1x64xf32, #tpu.memory_space<vmem>>, vector<1x64xf32>
    %130 = vector.broadcast %129 : vector<1x64xf32> to vector<64x64xf32>
    %131 = arith.addf %128, %130 : vector<64x64xf32>
    %132 = arith.mulf %131, %131 : vector<64x64xf32>
    %133 = arith.mulf %131, %132 : vector<64x64xf32>
    %cst_50 = arith.constant 4.471500e-02 : f32
    %134 = vector.broadcast %cst_50 : f32 to vector<64x64xf32>
    %135 = arith.mulf %134, %133 : vector<64x64xf32>
    %136 = arith.addf %131, %135 : vector<64x64xf32>
    %cst_51 = arith.constant 0.797884583 : f32
    %137 = vector.broadcast %cst_51 : f32 to vector<64x64xf32>
    %138 = arith.mulf %137, %136 : vector<64x64xf32>
    %139 = math.tanh %138 : vector<64x64xf32>
    %cst_52 = arith.constant 1.000000e+00 : f32
    %140 = vector.broadcast %cst_52 : f32 to vector<64x64xf32>
    %141 = arith.addf %140, %139 : vector<64x64xf32>
    %cst_53 = arith.constant 5.000000e-01 : f32
    %142 = vector.broadcast %cst_53 : f32 to vector<64x64xf32>
    %143 = arith.mulf %142, %141 : vector<64x64xf32>
    %144 = arith.mulf %131, %143 : vector<64x64xf32>
    %145 = arith.truncf %144 : vector<64x64xf32> to vector<64x64xbf16>
    %c0_54 = arith.constant 0 : index
    %c0_55 = arith.constant 0 : index
    %146 = vector.load %arg15[%c0_54, %c0_55] : memref<64x32xbf16, #tpu.memory_space<vmem>>, vector<64x32xbf16>
    %cst_56 = arith.constant dense<0.000000e+00> : vector<64x32xf32>
    %147 = tpu.matmul %145, %146, %cst_56 {dimension_numbers = #tpu.dot_dimension_numbers<[1], [0], [0], [1], [0, 0, 1, 1], [], []>} : vector<64x64xbf16>, vector<64x32xbf16>, vector<64x32xf32> -> vector<64x32xf32>
    %c0_57 = arith.constant 0 : index
    %c0_58 = arith.constant 0 : index
    %148 = vector.load %arg16[%c0_57, %c0_58] : memref<1x32xf32, #tpu.memory_space<vmem>>, vector<1x32xf32>
    %149 = vector.broadcast %148 : vector<1x32xf32> to vector<64x32xf32>
    %150 = arith.addf %147, %149 : vector<64x32xf32>
    %151 = arith.addf %125, %150 : vector<64x32xf32>
    %c0_59 = arith.constant 0 : index
    %c0_60 = arith.constant 0 : index
    %152 = vector.load %arg17[%c0_59, %c0_60] : memref<1x32xf32, #tpu.memory_space<vmem>>, vector<1x32xf32>
    %c0_61 = arith.constant 0 : index
    %c0_62 = arith.constant 0 : index
    %153 = vector.load %arg18[%c0_61, %c0_62] : memref<1x32xf32, #tpu.memory_space<vmem>>, vector<1x32xf32>
    %cst_63 = arith.constant dense<0.000000e+00> : vector<64xf32>
    %154 = vector.multi_reduction <add>, %151, %cst_63 [1] : vector<64x32xf32> to vector<64xf32>
    %155 = vector.shape_cast %154 : vector<64xf32> to vector<64x1xf32>
    %cst_64 = arith.constant 3.200000e+01 : f32
    %156 = vector.broadcast %cst_64 : f32 to vector<64x1xf32>
    %157 = arith.divf %155, %156 : vector<64x1xf32>
    %158 = vector.broadcast %157 : vector<64x1xf32> to vector<64x32xf32>
    %159 = arith.subf %151, %158 : vector<64x32xf32>
    %160 = arith.mulf %159, %159 : vector<64x32xf32>
    %cst_65 = arith.constant dense<0.000000e+00> : vector<64xf32>
    %161 = vector.multi_reduction <add>, %160, %cst_65 [1] : vector<64x32xf32> to vector<64xf32>
    %162 = vector.shape_cast %161 : vector<64xf32> to vector<64x1xf32>
    %cst_66 = arith.constant 3.200000e+01 : f32
    %163 = vector.broadcast %cst_66 : f32 to vector<64x1xf32>
    %164 = arith.divf %162, %163 : vector<64x1xf32>
    %165 = vector.broadcast %157 : vector<64x1xf32> to vector<64x32xf32>
    %166 = arith.subf %151, %165 : vector<64x32xf32>
    %cst_67 = arith.constant 9.99999996E-13 : f32
    %167 = vector.broadcast %cst_67 : f32 to vector<64x1xf32>
    %168 = arith.addf %164, %167 : vector<64x1xf32>
    %169 = math.rsqrt %168 : vector<64x1xf32>
    %170 = vector.broadcast %169 : vector<64x1xf32> to vector<64x32xf32>
    %171 = arith.mulf %166, %170 : vector<64x32xf32>
    %172 = vector.broadcast %152 : vector<1x32xf32> to vector<64x32xf32>
    %173 = arith.mulf %171, %172 : vector<64x32xf32>
    %174 = vector.broadcast %153 : vector<1x32xf32> to vector<64x32xf32>
    %175 = arith.addf %173, %174 : vector<64x32xf32>
    %176 = vector.shape_cast %175 : vector<64x32xf32> to vector<8x8x32xf32>
    %177 = vector.extract_strided_slice %176 {offsets = [0, 0, 0], sizes = [8, 1, 32], strides = [1, 1, 1]} : vector<8x8x32xf32> to vector<8x1x32xf32>
    %178 = vector.shape_cast %177 : vector<8x1x32xf32> to vector<8x32xf32>
    %179 = vector.extract_strided_slice %176 {offsets = [0, 1, 0], sizes = [8, 1, 32], strides = [1, 1, 1]} : vector<8x8x32xf32> to vector<8x1x32xf32>
    %180 = vector.shape_cast %179 : vector<8x1x32xf32> to vector<8x32xf32>
    %181 = vector.extract_strided_slice %176 {offsets = [0, 2, 0], sizes = [8, 1, 32], strides = [1, 1, 1]} : vector<8x8x32xf32> to vector<8x1x32xf32>
    %182 = vector.shape_cast %181 : vector<8x1x32xf32> to vector<8x32xf32>
    %183 = vector.extract_strided_slice %176 {offsets = [0, 3, 0], sizes = [8, 1, 32], strides = [1, 1, 1]} : vector<8x8x32xf32> to vector<8x1x32xf32>
    %184 = vector.shape_cast %183 : vector<8x1x32xf32> to vector<8x32xf32>
    %185 = vector.extract_strided_slice %176 {offsets = [0, 4, 0], sizes = [8, 1, 32], strides = [1, 1, 1]} : vector<8x8x32xf32> to vector<8x1x32xf32>
    %186 = vector.shape_cast %185 : vector<8x1x32xf32> to vector<8x32xf32>
    %187 = vector.extract_strided_slice %176 {offsets = [0, 5, 0], sizes = [8, 1, 32], strides = [1, 1, 1]} : vector<8x8x32xf32> to vector<8x1x32xf32>
    %188 = vector.shape_cast %187 : vector<8x1x32xf32> to vector<8x32xf32>
    %189 = vector.extract_strided_slice %176 {offsets = [0, 6, 0], sizes = [8, 1, 32], strides = [1, 1, 1]} : vector<8x8x32xf32> to vector<8x1x32xf32>
    %190 = vector.shape_cast %189 : vector<8x1x32xf32> to vector<8x32xf32>
    %191 = vector.extract_strided_slice %176 {offsets = [0, 7, 0], sizes = [8, 1, 32], strides = [1, 1, 1]} : vector<8x8x32xf32> to vector<8x1x32xf32>
    %192 = vector.shape_cast %191 : vector<8x1x32xf32> to vector<8x32xf32>
    %193 = tpu.concatenate %178, %180, %182, %184, %186, %188, %190, %192 in 1 : vector<8x32xf32>, vector<8x32xf32>, vector<8x32xf32>, vector<8x32xf32>, vector<8x32xf32>, vector<8x32xf32>, vector<8x32xf32>, vector<8x32xf32> -> vector<8x256xf32>
    %c0_68 = arith.constant 0 : index
    %c0_69 = arith.constant 0 : index
    %194 = vector.load %arg19[%c0_68, %c0_69] : memref<8x256xf32, #tpu.memory_space<vmem>>, vector<8x256xf32>
    tpu.vector_store %arg19[%c0_68, %c0_69], %193 {strides = array<i32>} : memref<8x256xf32, #tpu.memory_space<vmem>>, vector<8x256xf32>,
    return
  }
  func.func @transform_0(%arg0: i32) -> (i32, i32) {
    %c0_i32 = arith.constant 0 : i32
    %c0_i32_0 = arith.constant 0 : i32
    return %arg0, %c0_i32 : i32, i32
  }
  func.func @transform_1(%arg0: i32) -> (i32, i32) {
    %c0_i32 = arith.constant 0 : i32
    %c0_i32_0 = arith.constant 0 : i32
    return %arg0, %c0_i32 : i32, i32
  }
  func.func @transform_2(%arg0: i32) -> (i32, i32) {
    %c0_i32 = arith.constant 0 : i32
    %c0_i32_0 = arith.constant 0 : i32
    %c0_i32_1 = arith.constant 0 : i32
    return %c0_i32, %c0_i32_0 : i32, i32
  }
  func.func @transform_3(%arg0: i32) -> (i32, i32) {
    %c0_i32 = arith.constant 0 : i32
    %c0_i32_0 = arith.constant 0 : i32
    %c0_i32_1 = arith.constant 0 : i32
    return %c0_i32, %c0_i32_0 : i32, i32
  }
  func.func @transform_4(%arg0: i32) -> (i32, i32) {
    %c0_i32 = arith.constant 0 : i32
    %c0_i32_0 = arith.constant 0 : i32
    %c0_i32_1 = arith.constant 0 : i32
    return %c0_i32, %c0_i32_0 : i32, i32
  }
  func.func @transform_5(%arg0: i32) -> (i32, i32) {
    %c0_i32 = arith.constant 0 : i32
    %c0_i32_0 = arith.constant 0 : i32
    %c0_i32_1 = arith.constant 0 : i32
    return %c0_i32, %c0_i32_0 : i32, i32
  }
  func.func @transform_6(%arg0: i32) -> (i32, i32) {
    %c0_i32 = arith.constant 0 : i32
    %c0_i32_0 = arith.constant 0 : i32
    %c0_i32_1 = arith.constant 0 : i32
    return %c0_i32, %c0_i32_0 : i32, i32
  }
  func.func @transform_7(%arg0: i32) -> (i32, i32) {
    %c0_i32 = arith.constant 0 : i32
    %c0_i32_0 = arith.constant 0 : i32
    %c0_i32_1 = arith.constant 0 : i32
    return %c0_i32, %c0_i32_0 : i32, i32
  }
  func.func @transform_8(%arg0: i32) -> (i32, i32) {
    %c0_i32 = arith.constant 0 : i32
    %c0_i32_0 = arith.constant 0 : i32
    %c0_i32_1 = arith.constant 0 : i32
    return %c0_i32, %c0_i32_0 : i32, i32
  }
  func.func @transform_9(%arg0: i32) -> (i32, i32) {
    %c0_i32 = arith.constant 0 : i32
    %c0_i32_0 = arith.constant 0 : i32
    %c0_i32_1 = arith.constant 0 : i32
    return %c0_i32, %c0_i32_0 : i32, i32
  }
  func.func @transform_10(%arg0: i32) -> (i32, i32) {
    %c0_i32 = arith.constant 0 : i32
    %c0_i32_0 = arith.constant 0 : i32
    %c0_i32_1 = arith.constant 0 : i32
    return %c0_i32, %c0_i32_0 : i32, i32
  }
  func.func @transform_11(%arg0: i32) -> (i32, i32) {
    %c0_i32 = arith.constant 0 : i32
    %c0_i32_0 = arith.constant 0 : i32
    %c0_i32_1 = arith.constant 0 : i32
    return %c0_i32, %c0_i32_0 : i32, i32
  }
  func.func @transform_12(%arg0: i32) -> (i32, i32) {
    %c0_i32 = arith.constant 0 : i32
    %c0_i32_0 = arith.constant 0 : i32
    %c0_i32_1 = arith.constant 0 : i32
    return %c0_i32, %c0_i32_0 : i32, i32
  }
  func.func @transform_13(%arg0: i32) -> (i32, i32) {
    %c0_i32 = arith.constant 0 : i32
    %c0_i32_0 = arith.constant 0 : i32
    %c0_i32_1 = arith.constant 0 : i32
    return %c0_i32, %c0_i32_0 : i32, i32
  }
  func.func @transform_14(%arg0: i32) -> (i32, i32) {
    %c0_i32 = arith.constant 0 : i32
    %c0_i32_0 = arith.constant 0 : i32
    %c0_i32_1 = arith.constant 0 : i32
    return %c0_i32, %c0_i32_0 : i32, i32
  }
  func.func @transform_15(%arg0: i32) -> (i32, i32) {
    %c0_i32 = arith.constant 0 : i32
    %c0_i32_0 = arith.constant 0 : i32
    %c0_i32_1 = arith.constant 0 : i32
    return %c0_i32, %c0_i32_0 : i32, i32
  }
  func.func @transform_16(%arg0: i32) -> (i32, i32) {
    %c0_i32 = arith.constant 0 : i32
    %c0_i32_0 = arith.constant 0 : i32
    %c0_i32_1 = arith.constant 0 : i32
    return %c0_i32, %c0_i32_0 : i32, i32
  }
  func.func @transform_17(%arg0: i32) -> (i32, i32) {
    %c0_i32 = arith.constant 0 : i32
    %c0_i32_0 = arith.constant 0 : i32
    %c0_i32_1 = arith.constant 0 : i32
    return %c0_i32, %c0_i32_0 : i32, i32
  }
  func.func @transform_18(%arg0: i32) -> (i32, i32) {
    %c0_i32 = arith.constant 0 : i32
    %c0_i32_0 = arith.constant 0 : i32
    return %arg0, %c0_i32 : i32, i32
  }
}

</mosaic_0001>

<bundles_post_ra>
// kernel: tpu_custom_call.1
= control target key start
LH: loop header
LB: loop body
LE: loop exit
PB: predicated region body
PF: predicated region fallthrough
CT: control target
= control target key end

     0   :  { %s3948_s0 = inlined_call_operand.vmem [shape: s32[8,8], index: 0, kind: input, shape index: {}]   ;;  %s3949_s1 = inlined_call_operand.vmem [shape: f32[8,8], index: 1, kind: input, shape index: {}]   ;;  %s3950_s2 = inlined_call_operand.vmem [shape: bf16[64,32], index: 2, kind: input, shape index: {}]   ;;  %s3951_s3 = inlined_call_operand.vmem [shape: f32[8,32], index: 3, kind: input, shape index: {}]   ;;  %s3952_s4 = inlined_call_operand.vmem [shape: f32[1,32], index: 4, kind: input, shape index: {}]   ;;  %s3953_s5 = inlined_call_operand.vmem [shape: f32[1,32], index: 5, kind: input, shape index: {}]   ;;  %s3954_s6 = inlined_call_operand.vmem [shape: bf16[32,96], index: 6, kind: input, shape index: {}]   ;;  %s3955_s7 = inlined_call_operand.vmem [shape: f32[1,96], index: 7, kind: input, shape index: {}]   ;;  %s3956_s8 = inlined_call_operand.vmem [shape: bf16[32,32], index: 8, kind: input, shape index: {}]   ;;  %s3957_s9 = inlined_call_operand.vmem [shape: f32[1,32], index: 9, kind: input, shape index: {}]   ;;  %s3958_s10 = inlined_call_operand.vmem [shape: f32[1,32], index: 10, kind: input, shape index: {}]   ;;  %s3959_s11 = inlined_call_operand.vmem [shape: f32[1,32], index: 11, kind: input, shape index: {}]   ;;  %s3960_s12 = inlined_call_operand.vmem [shape: bf16[32,64], index: 12, kind: input, shape index: {}]   ;;  %s3961_s13 = inlined_call_operand.vmem [shape: f32[1,64], index: 13, kind: input, shape index: {}]   ;;  %s3962_s14 = inlined_call_operand.vmem [shape: bf16[64,32], index: 14, kind: input, shape index: {}]   ;;  %s3963_s15 = inlined_call_operand.vmem [shape: f32[1,32], index: 15, kind: input, shape index: {}]   ;;  %s3964_s16 = inlined_call_operand.vmem [shape: f32[1,32], index: 16, kind: input, shape index: {}]   ;;  %s3965_s17 = inlined_call_operand.vmem [shape: f32[1,32], index: 17, kind: input, shape index: {}]   ;;  %s3966_s18 = inlined_call_operand.hbm [shape: f32[8,256], index: 18, kind: output, shape index: {}]  }
   0x1   :  { %3968 = sst [smem:[#allocation5_spill]] %s3948_s0 }
   0x2   :  { %3969 = sst [smem:[#allocation6_spill]] %s3949_s1 }
   0x3   :  { %3970 = sst [smem:[#allocation7_spill]] %s3950_s2 }
   0x4   :  { %v62_v0 = vlaneseq  ;;  %s3971_s29 = sld [smem:[#allocation5_spill]] }
   0x6   :  { %v66_v1 = vshrl.u32 %v62_v0, 7 }
   0x8   :  { %2659 = vset.pattern.permute.xlu1 %v66_v1  ;;  %2658 = vset.pattern.permute.xlu0 %v66_v1 }
   0x9   :  { %2660 = vset.pattern.permute.xlu2 %v66_v1 }
   0xa   :  { %v61_v2 = vld [vmem:[%s3971_s29] sm:$0xff] }
   0xb   :  { %23 = vsyncpa [#allocation3], 0  ;;  %v78_v3 = vperm.slane %v61_v2, 2  ;;  %v64_v4 = vperm.slane %v61_v2, 0  ;;  %v92_v5 = vperm.slane %v61_v2, 4  ;;  %v85_v6 = vperm.slane %v61_v2, 3 }
   0xc   :  { %v71_v7 = vperm.slane %v61_v2, 1  ;;  %v99_v8 = vperm.slane %v61_v2, 5  ;;  %v113_v9 = vperm.slane %v61_v2, 7  ;;  %v106_v10 = vperm.slane %v61_v2, 6  ;;  %s3972_s19 = sld [smem:[#allocation7_spill]]  ;;  %v246_v53 = vld [vmem:[%s3951_s3] sm:$0xff] }
   0xd   :  { %v63_v15 = vand.u32 127, %v62_v0  ;;  %v2877_v18 = vmov 0.0   ;;  %vm204_vm2 = vcmask 523264   ;;  %vm257_vm9 = vcmask 261120   ;;  %s3973_s21 = sld [smem:[#allocation6_spill]]  ;;  %s2881_s22 = smov 80  }
   0xe   :  { %s2882_s2 = smov 112   ;;  %s2883_s23 = smov 48  }
   0xf   :  { %s2884_s3 = smov 16   ;;  %s2886_s27 = smov [#allocation2]  }
  0x10   :  { %83 = vperm.xlu1 %2659, %v78_v3   ;;  %69 = vperm.xlu0 %2658, %v64_v4  }
  0x11   :  { %97 = vperm.xlu2 %2660, %v92_v5  }
  0x12   :  { %v2635_v11 = vld [vmem:[%s3972_s19 + $0x18] sm:$0xff]  ;;  %v2634_v12 = vld [vmem:[%s3972_s19 + $0x10] sm:$0xff]  ;;  %v2633_v13 = vld [vmem:[%s3972_s19 + $0x8] sm:$0xff] }
  0x13   :  { %221 = vmatpush.bf16.msra.mxu0 %v2635_v11  ;;  %v2632_v14 = vld [vmem:[%s3972_s19] sm:$0xff]  ;;  %s2879_s19 = smov 96  }
  0x17   :  { %222 = vmatpush.bf16.msra.mxu0 %v2634_v12 }
  0x18   :  { %90 = vperm.xlu1 %2659, %v85_v6   ;;  %76 = vperm.xlu0 %2658, %v71_v7  }
  0x19   :  { %104 = vperm.xlu2 %2660, %v99_v8  }
  0x1b   :  { %223 = vmatpush.bf16.msra.mxu0 %v2633_v13 }
  0x1f   :  { %224 = vmatpush.bf16.msra.mxu0 %v2632_v14  ;;  %v2878_v14 = vmov 32.0  }
  0x20   :  { %118 = vperm.xlu1 %2659, %v113_v9   ;;  %111 = vperm.xlu0 %2658, %v106_v10   ;;  %2721 = vrcp.f32 %v2878_v14 }
  0x6b   :  { %v98_v28 = vpop.permute.xlu2 %97 }
  0x6c   :  { %vm124_vm5 = vcmp.eq.s32.totalorder %v98_v28, %v63_v15 }
  0x6d   :  { %v2504_v37 = vsel %vm124_vm5, 1.0, %v2877_v18 }
  0x6e   :  { %v148_v39 = vpack.c.bf16 %v2504_v37, %v2504_v37 }
  0x70   :  { %v172_v41 = vunpack.c.l.b16 %v148_v39 }
  0x73   :  { %v105_v35 = vpop.permute.xlu2 %104 }
  0x74   :  { %vm125_vm6 = vcmp.eq.s32.totalorder %v105_v35, %v63_v15 }
  0x75   :  { %v2505_v38 = vsel %vm125_vm6, 1.0, %v2877_v18 }
  0x76   :  { %v149_v40 = vpack.c.bf16 %v2505_v38, %v2505_v38 }
  0x78   :  { %v173_v42 = vunpack.c.l.b16 %v149_v40 }
  0x7a   :  { %v178_v43 = vpack.c.b16 %v173_v42, %v172_v41 }
  0x82   :  { %v70_v16 = vpop.permute.xlu0 %69  ;;  %v84_v17 = vpop.permute.xlu1 %83 }
  0x83   :  { %vm120_vm0 = vcmp.eq.s32.totalorder %v70_v16, %v63_v15  ;;  %vm122_vm3 = vcmp.eq.s32.totalorder %v84_v17, %v63_v15 }
  0x84   :  { %v2500_v19 = vsel %vm120_vm0, 1.0, %v2877_v18  ;;  %v2502_v29 = vsel %vm122_vm3, 1.0, %v2877_v18 }
  0x85   :  { %v144_v21 = vpack.c.bf16 %v2500_v19, %v2500_v19  ;;  %v146_v31 = vpack.c.bf16 %v2502_v29, %v2502_v29 }
  0x87   :  { %v168_v24 = vunpack.c.l.b16 %v144_v21  ;;  %v170_v33 = vunpack.c.l.b16 %v146_v31 }
  0x8a   :  { %v77_v20 = vpop.permute.xlu0 %76  ;;  %v91_v27 = vpop.permute.xlu1 %90 }
  0x8b   :  { %vm121_vm1 = vcmp.eq.s32.totalorder %v77_v20, %v63_v15  ;;  %vm123_vm4 = vcmp.eq.s32.totalorder %v91_v27, %v63_v15 }
  0x8c   :  { %v2501_v22 = vsel %vm121_vm1, 1.0, %v2877_v18  ;;  %v2503_v30 = vsel %vm123_vm4, 1.0, %v2877_v18 }
  0x8d   :  { %v145_v23 = vpack.c.bf16 %v2501_v22, %v2501_v22  ;;  %v147_v32 = vpack.c.bf16 %v2503_v30, %v2503_v30 }
  0x8f   :  { %v169_v25 = vunpack.c.l.b16 %v145_v23  ;;  %v171_v34 = vunpack.c.l.b16 %v147_v32 }
  0x91   :  { %v176_v26 = vpack.c.b16 %v169_v25, %v168_v24  ;;  %v177_v36 = vpack.c.b16 %v171_v34, %v170_v33 }
  0x92   :  { %v119_v44 = vpop.permute.xlu1 %118  ;;  %v112_v45 = vpop.permute.xlu0 %111 }
  0x93   :  { %2524 = vmatmul.msk.bf16.vlgmr.msra.gmra.mxu0 %vm204_vm2, %v176_v26  ;;  %vm127_vm7 = vcmp.eq.s32.totalorder %v119_v44, %v63_v15  ;;  %vm126_vm8 = vcmp.eq.s32.totalorder %v112_v45, %v63_v15  ;;  %v2722_v15 = vpop.eup %2721 }
  0x94   :  { %v2507_v46 = vsel %vm127_vm7, 1.0, %v2877_v18  ;;  %v2506_v47 = vsel %vm126_vm8, 1.0, %v2877_v18  ;;  %v283_v16 = vmul.f32 32.0, %v2722_v15  ;;  %vm287_vm10 = vweird.f32 %v2722_v15 }
  0x95   :  { %v151_v48 = vpack.c.bf16 %v2507_v46, %v2507_v46  ;;  %v150_v49 = vpack.c.bf16 %v2506_v47, %v2506_v47 }
  0x96   :  { %v284_v17 = vsub.f32 1.0, %v283_v16 }
  0x97   :  { %v175_v50 = vunpack.c.l.b16 %v151_v48  ;;  %v174_v51 = vunpack.c.l.b16 %v150_v49 }
  0x98   :  { %v285_v18 = vmul.f32 %v2722_v15, %v284_v17 }
  0x99   :  { %v179_v52 = vpack.c.b16 %v175_v50, %v174_v51 }
  0x9a   :  { %v286_v19 = vadd.f32 %v2722_v15, %v285_v18 }
  0x9c   :  { %v3012_v20 = vsel %vm287_vm10, %v2722_v15, %v286_v19 }
  0xa3   :  { %2525 = vmatmul.msk.bf16.gmra.mxu0 %vm204_vm2, %v177_v36 }
  0xb3   :  { %2526 = vmatmul.msk.bf16.gmra.mxu0 %vm204_vm2, %v178_v43 }
  0xc3   :  { %2527 = vmatmul.msk.bf16.gmra.mxu0 %vm204_vm2, %v179_v52 }
 0x110   :  { %v226_v54 = vpop.f32.mrf.mxu0 }
 0x111   :  { %v247_v55 = vadd.f32 %v246_v53, %v226_v54 }
 0x113   :  { %v258_v56 = vsel %vm257_vm9, %v247_v55, 0.0 }
 0x114   :  { %259 = vadd.xlane.f32.xlu1 %v258_v56 }
 0x118   :  { %v228_v57 = vpop.f32.mrf.mxu0 }
 0x119   :  { %v248_v61 = vadd.f32 %v246_v53, %v228_v57 }
 0x11b   :  { %v261_v0 = vsel %vm257_vm9, %v248_v61, 0.0 }
 0x120   :  { %v231_v58 = vpop.f32.mrf.mxu0 }
 0x121   :  { %v249_v59 = vadd.f32 %v246_v53, %v231_v58 }
 0x123   :  { %v264_v60 = vsel %vm257_vm9, %v249_v59, 0.0 }
 0x124   :  { %265 = vadd.xlane.f32.xlu2 %v264_v60 }
 0x128   :  { %v233_v62 = vpop.f32.mrf.mxu0 }
 0x129   :  { %v250_v63 = vadd.f32 %v246_v53, %v233_v62 }
 0x12b   :  { %v267_v1 = vsel %vm257_vm9, %v250_v63, 0.0 }
 0x12c   :  { %262 = vadd.xlane.f32.xlu2 %v261_v0  ;;  %268 = vadd.xlane.f32.xlu0 %v267_v1  ;;  %v2637_v0 = vld [vmem:[%s3954_s6 + $0x8] sm:$0xff] }
 0x12d   :  { %505 = vmatpush.bf16.msra.mxu1 %v2637_v0  ;;  %2646 = vmatpush.bf16.msra.mxu2 %v2637_v0 }
 0x130   :  { %v236_v2 = vpop.f32.mrf.mxu0 }
 0x131   :  { %v251_v3 = vadd.f32 %v246_v53, %v236_v2 }
 0x133   :  { %v270_v4 = vsel %vm257_vm9, %v251_v3, 0.0 }
 0x134   :  { %271 = vadd.xlane.f32.xlu2 %v270_v4 }
 0x138   :  { %v238_v5 = vpop.f32.mrf.mxu0 }
 0x139   :  { %v252_v6 = vadd.f32 %v246_v53, %v238_v5 }
 0x13b   :  { %v273_v7 = vsel %vm257_vm9, %v252_v6, 0.0 }
 0x13c   :  { %274 = vadd.xlane.f32.xlu0 %v273_v7 }
 0x140   :  { %v241_v8 = vpop.f32.mrf.mxu0 }
 0x141   :  { %v253_v9 = vadd.f32 %v246_v53, %v241_v8 }
 0x143   :  { %v276_v10 = vsel %vm257_vm9, %v253_v9, 0.0 }
 0x144   :  { %277 = vadd.xlane.f32.xlu1 %v276_v10 }
 0x148   :  { %v243_v11 = vpop.f32.mrf.mxu0 }
 0x149   :  { %v254_v12 = vadd.f32 %v246_v53, %v243_v11 }
 0x14b   :  { %v279_v13 = vsel %vm257_vm9, %v254_v12, 0.0 }
 0x14c   :  { %280 = vadd.xlane.f32.xlu2 %v279_v13 }
 0x187   :  { %v260_v21 = vpop.xlane.xlu1 %259 }
 0x188   :  { %v289_v22 = vmul.f32 %v3012_v20, %v260_v21 }
 0x18a   :  { %v3015_v23 = vsub.f32 %v247_v55, %v289_v22 }
 0x18c   :  { %v305_v24 = vmul.f32 %v3015_v23, %v3015_v23 }
 0x18e   :  { %v313_v25 = vsel %vm257_vm9, %v305_v24, 0.0 }
 0x18f   :  { %314 = vadd.xlane.f32.xlu2 %v313_v25 }
 0x197   :  { %v266_v26 = vpop.xlane.xlu2 %265 }
 0x198   :  { %v291_v27 = vmul.f32 %v3012_v20, %v266_v26 }
 0x19a   :  { %v3021_v28 = vsub.f32 %v249_v59, %v291_v27 }
 0x19c   :  { %v307_v29 = vmul.f32 %v3021_v28, %v3021_v28 }
 0x19e   :  { %v319_v30 = vsel %vm257_vm9, %v307_v29, 0.0 }
 0x19f   :  { %v263_v31 = vpop.xlane.xlu2 %262  ;;  %320 = vadd.xlane.f32.xlu0 %v319_v30  ;;  %v269_v32 = vpop.xlane.xlu0 %268 }
 0x1a0   :  { %v290_v33 = vmul.f32 %v3012_v20, %v263_v31  ;;  %v292_v34 = vmul.f32 %v3012_v20, %v269_v32 }
 0x1a2   :  { %v3028_v35 = vsub.f32 %v248_v61, %v290_v33  ;;  %v3030_v36 = vsub.f32 %v250_v63, %v292_v34 }
 0x1a4   :  { %v306_v37 = vmul.f32 %v3028_v35, %v3028_v35  ;;  %v308_v38 = vmul.f32 %v3030_v36, %v3030_v36 }
 0x1a6   :  { %v316_v39 = vsel %vm257_vm9, %v306_v37, 0.0  ;;  %v322_v40 = vsel %vm257_vm9, %v308_v38, 0.0 }
 0x1a7   :  { %v272_v41 = vpop.xlane.xlu2 %271  ;;  %317 = vadd.xlane.f32.xlu0 %v316_v39  ;;  %323 = vadd.xlane.f32.xlu1 %v322_v40 }
 0x1a8   :  { %v293_v42 = vmul.f32 %v3012_v20, %v272_v41 }
 0x1aa   :  { %v3039_v43 = vsub.f32 %v251_v3, %v293_v42 }
 0x1ac   :  { %v309_v44 = vmul.f32 %v3039_v43, %v3039_v43 }
 0x1ae   :  { %v325_v45 = vsel %vm257_vm9, %v309_v44, 0.0 }
 0x1af   :  { %326 = vadd.xlane.f32.xlu1 %v325_v45  ;;  %v275_v46 = vpop.xlane.xlu0 %274 }
 0x1b0   :  { %v294_v47 = vmul.f32 %v3012_v20, %v275_v46 }
 0x1b2   :  { %v3045_v48 = vsub.f32 %v252_v6, %v294_v47  ;;  %v2636_v6 = vld [vmem:[%s3954_s6] sm:$0xff]  ;;  %s2491_s6 = sshll.u32 %s3966_s18, 4  ;;  %s2492_s6 = int_to_ptr.hbm [resolvable:$true] %s2491_s6 }
 0x1b3   :  { %506 = vmatpush.bf16.msra.mxu1 %v2636_v6  ;;  %2647 = vmatpush.bf16.msra.mxu2 %v2636_v6 }
 0x1b4   :  { %v310_v49 = vmul.f32 %v3045_v48, %v3045_v48 }
 0x1b6   :  { %v328_v50 = vsel %vm257_vm9, %v310_v49, 0.0 }
 0x1b7   :  { %v278_v51 = vpop.xlane.xlu1 %277  ;;  %329 = vadd.xlane.f32.xlu2 %v328_v50 }
 0x1b8   :  { %v295_v52 = vmul.f32 %v3012_v20, %v278_v51  ;;  %v3082_v51 = vld [vmem:[%s3952_s4] ss:$0 sm:$0xff] }
 0x1ba   :  { %v3051_v53 = vsub.f32 %v253_v9, %v295_v52 }
 0x1bc   :  { %v311_v54 = vmul.f32 %v3051_v53, %v3051_v53 }
 0x1be   :  { %v331_v55 = vsel %vm257_vm9, %v311_v54, 0.0 }
 0x1bf   :  { %332 = vadd.xlane.f32.xlu0 %v331_v55  ;;  %v281_v56 = vpop.xlane.xlu2 %280 }
 0x1c0   :  { %v296_v57 = vmul.f32 %v3012_v20, %v281_v56 }
 0x1c2   :  { %v3057_v58 = vsub.f32 %v254_v12, %v296_v57 }
 0x1c4   :  { %v312_v59 = vmul.f32 %v3057_v58, %v3057_v58 }
 0x1c6   :  { %v334_v60 = vsel %vm257_vm9, %v312_v59, 0.0 }
 0x1c7   :  { %335 = vadd.xlane.f32.xlu1 %v334_v60  ;;  %v3090_v60 = vld [vmem:[%s3953_s5] ss:$0 sm:$0xff] }
 0x202   :  { %v315_v61 = vpop.xlane.xlu2 %314 }
 0x203   :  { %v337_v62 = vmul.f32 %v315_v61, %v3012_v20 }
 0x205   :  { %v345_v63 = vadd.f32 1e-12, %v337_v62 }
 0x207   :  { %2723 = vrsqrt.f32 %v345_v63  ;;  %vm359_vm13 = vweird.f32 %v345_v63 }
 0x20d   :  { %v2724_v1 = vpop.eup %2723 }
 0x20e   :  { %v354_v4 = vmul.f32 %v2724_v1, %v345_v63  ;;  %vm360_vm11 = vweird.f32 %v2724_v1 }
 0x20f   :  { %vm361_vm14 = vmor %vm359_vm13, %vm360_vm11 }
 0x210   :  { %v355_v7 = vmul.f32 %v2724_v1, %v354_v4 }
 0x212   :  { %v321_v2 = vpop.xlane.xlu0 %320  ;;  %v356_v13 = vmul.f32 0.5, %v355_v7 }
 0x213   :  { %v339_v3 = vmul.f32 %v321_v2, %v3012_v20 }
 0x214   :  { %v357_v18 = vsub.f32 1.5, %v356_v13 }
 0x215   :  { %v347_v5 = vadd.f32 1e-12, %v339_v3 }
 0x216   :  { %v358_v26 = vmul.f32 %v2724_v1, %v357_v18 }
 0x217   :  { %2725 = vrsqrt.f32 %v347_v5  ;;  %vm379_vm15 = vweird.f32 %v347_v5 }
 0x218   :  { %v362_v34 = vsel %vm361_vm14, %v2724_v1, %v358_v26 }
 0x219   :  { %v433_v44 = vmul.f32 %v362_v34, %v3015_v23 }
 0x21a   :  { %v324_v8 = vpop.xlane.xlu1 %323  ;;  %v318_v9 = vpop.xlane.xlu0 %317 }
 0x21b   :  { %v340_v10 = vmul.f32 %v324_v8, %v3012_v20  ;;  %v338_v11 = vmul.f32 %v318_v9, %v3012_v20  ;;  %v444_v59 = vmul.f32 %v3082_v51, %v433_v44 }
 0x21d   :  { %v2726_v12 = vpop.eup %2725  ;;  %v348_v14 = vadd.f32 1e-12, %v340_v10  ;;  %v346_v15 = vadd.f32 1e-12, %v338_v11  ;;  %v3098_v6 = vadd.f32 %v3090_v60, %v444_v59 }
 0x21e   :  { %v374_v16 = vmul.f32 %v2726_v12, %v347_v5  ;;  %vm380_vm12 = vweird.f32 %v2726_v12 }
 0x21f   :  { %2727 = vrsqrt.f32 %v348_v14  ;;  %vm381_vm0 = vmor %vm379_vm15, %vm380_vm12  ;;  %vm389_vm4 = vweird.f32 %v348_v14  ;;  %vm369_vm6 = vweird.f32 %v346_v15 }
 0x220   :  { %v375_v17 = vmul.f32 %v2726_v12, %v374_v16  ;;  %2729 = vrsqrt.f32 %v346_v15 }
 0x222   :  { %v376_v19 = vmul.f32 0.5, %v375_v17  ;;  %v327_v21 = vpop.xlane.xlu1 %326 }
 0x223   :  { %v341_v22 = vmul.f32 %v327_v21, %v3012_v20 }
 0x224   :  { %v377_v24 = vsub.f32 1.5, %v376_v19 }
 0x225   :  { %v2728_v25 = vpop.eup %2727  ;;  %v3073_v27 = vadd.f32 1e-12, %v341_v22 }
 0x226   :  { %v2730_v29 = vpop.eup %2729  ;;  %v378_v30 = vmul.f32 %v2726_v12, %v377_v24  ;;  %v384_v31 = vmul.f32 %v2728_v25, %v348_v14  ;;  %vm390_vm1 = vweird.f32 %v2728_v25 }
 0x227   :  { %v364_v32 = vmul.f32 %v2730_v29, %v346_v15  ;;  %2731 = vrsqrt.f32 %v3073_v27  ;;  %vm370_vm3 = vweird.f32 %v2730_v29  ;;  %vm391_vm5 = vmor %vm389_vm4, %vm390_vm1  ;;  %vm399_vm10 = vweird.f32 %v3073_v27 }
 0x228   :  { %v385_v33 = vmul.f32 %v2728_v25, %v384_v31  ;;  %v382_v38 = vsel %vm381_vm0, %v2726_v12, %v378_v30  ;;  %vm371_vm7 = vmor %vm369_vm6, %vm370_vm3  ;;  %vm558_vm6 = vcmask 130048  }
 0x229   :  { %v365_v37 = vmul.f32 %v2730_v29, %v364_v32  ;;  %v435_v47 = vmul.f32 %v382_v38, %v3021_v28 }
 0x22a   :  { %v386_v39 = vmul.f32 0.5, %v385_v33  ;;  %v330_v40 = vpop.xlane.xlu2 %329 }
 0x22b   :  { %v366_v41 = vmul.f32 0.5, %v365_v37  ;;  %v342_v42 = vmul.f32 %v330_v40, %v3012_v20  ;;  %v446_v61 = vmul.f32 %v3082_v51, %v435_v47 }
 0x22c   :  { %v387_v45 = vsub.f32 1.5, %v386_v39 }
 0x22d   :  { %v2732_v46 = vpop.eup %2731  ;;  %v367_v49 = vsub.f32 1.5, %v366_v41  ;;  %v350_v50 = vadd.f32 1e-12, %v342_v42  ;;  %v3101_v7 = vadd.f32 %v3090_v60, %v446_v61 }
 0x22e   :  { %v388_v52 = vmul.f32 %v2728_v25, %v387_v45  ;;  %v394_v54 = vmul.f32 %v2732_v46, %v3073_v27  ;;  %vm400_vm8 = vweird.f32 %v2732_v46 }
 0x22f   :  { %v368_v55 = vmul.f32 %v2730_v29, %v367_v49  ;;  %2733 = vrsqrt.f32 %v350_v50  ;;  %vm401_vm11 = vmor %vm399_vm10, %vm400_vm8  ;;  %vm409_vm13 = vweird.f32 %v350_v50 }
 0x230   :  { %v392_v23 = vsel %vm391_vm5, %v2728_v25, %v388_v52  ;;  %v395_v56 = vmul.f32 %v2732_v46, %v394_v54 }
 0x231   :  { %v436_v28 = vmul.f32 %v392_v23, %v3030_v36  ;;  %v372_v57 = vsel %vm371_vm7, %v2730_v29, %v368_v55  ;;  %vm772_vm7 = vcmask 64512  }
 0x232   :  { %v434_v62 = vmul.f32 %v372_v57, %v3028_v35  ;;  %v396_v63 = vmul.f32 0.5, %v395_v56  ;;  %v333_v0 = vpop.xlane.xlu0 %332 }
 0x233   :  { %v343_v1 = vmul.f32 %v333_v0, %v3012_v20  ;;  %v447_v2 = vmul.f32 %v3082_v51, %v436_v28 }
 0x234   :  { %v397_v3 = vsub.f32 1.5, %v396_v63  ;;  %v445_v36 = vmul.f32 %v3082_v51, %v434_v62 }
 0x235   :  { %v2734_v4 = vpop.eup %2733  ;;  %v351_v5 = vadd.f32 1e-12, %v343_v1  ;;  %v3104_v8 = vadd.f32 %v3090_v60, %v447_v2 }
 0x236   :  { %v398_v35 = vmul.f32 %v2732_v46, %v397_v3  ;;  %v404_v9 = vmul.f32 %v2734_v4, %v350_v50  ;;  %v3107_v10 = vadd.f32 %v3090_v60, %v445_v36  ;;  %vm410_vm12 = vweird.f32 %v2734_v4 }
 0x237   :  { %2735 = vrsqrt.f32 %v351_v5  ;;  %v464_v11 = vpack.c.bf16 %v3104_v8, %v3101_v7  ;;  %vm411_vm14 = vmor %vm409_vm13, %vm410_vm12  ;;  %vm419_vm0 = vweird.f32 %v351_v5 }
 0x238   :  { %v405_v12 = vmul.f32 %v2734_v4, %v404_v9  ;;  %v463_v13 = vpack.c.bf16 %v3107_v10, %v3098_v6  ;;  %v402_v14 = vsel %vm401_vm11, %v2732_v46, %v398_v35 }
 0x239   :  { %2537 = vmatmul.msk.bf16.vlgmr.msra.gmra.mxu2 %vm257_vm9, %v464_v11  ;;  %v437_v21 = vmul.f32 %v402_v14, %v3039_v43 }
 0x23a   :  { %v406_v15 = vmul.f32 0.5, %v405_v12  ;;  %2536 = vmatmul.msk.bf16.vlgmr.msra.gmra.mxu1 %vm257_vm9, %v463_v13  ;;  %v336_v16 = vpop.xlane.xlu1 %335 }
 0x23b   :  { %v344_v17 = vmul.f32 %v336_v16, %v3012_v20  ;;  %v448_v30 = vmul.f32 %v3082_v51, %v437_v21 }
 0x23c   :  { %v407_v18 = vsub.f32 1.5, %v406_v15 }
 0x23d   :  { %v2736_v19 = vpop.eup %2735  ;;  %v352_v22 = vadd.f32 1e-12, %v344_v17  ;;  %v3122_v37 = vadd.f32 %v3090_v60, %v448_v30 }
 0x23e   :  { %v408_v24 = vmul.f32 %v2734_v4, %v407_v18  ;;  %v414_v25 = vmul.f32 %v2736_v19, %v351_v5  ;;  %vm420_vm15 = vweird.f32 %v2736_v19 }
 0x23f   :  { %2737 = vrsqrt.f32 %v352_v22  ;;  %vm421_vm1 = vmor %vm419_vm0, %vm420_vm15  ;;  %vm429_vm4 = vweird.f32 %v352_v22 }
 0x240   :  { %v412_v26 = vsel %vm411_vm14, %v2734_v4, %v408_v24  ;;  %v415_v27 = vmul.f32 %v2736_v19, %v414_v25 }
 0x241   :  { %v438_v29 = vmul.f32 %v412_v26, %v3045_v48 }
 0x242   :  { %v416_v31 = vmul.f32 0.5, %v415_v27  ;;  %v528_v27 = vld [vmem:[%s3973_s21] sm:$0xff] }
 0x243   :  { %v449_v32 = vmul.f32 %v3082_v51, %v438_v29  ;;  %v529_v29 = vsub.f32 1.0, %v528_v27 }
 0x244   :  { %v417_v33 = vsub.f32 1.5, %v416_v31 }
 0x245   :  { %v2738_v34 = vpop.eup %2737  ;;  %v3125_v43 = vadd.f32 %v3090_v60, %v449_v32  ;;  %v3220_v30 = vmul.f32 -1e+09, %v529_v29 }
 0x246   :  { %v418_v38 = vmul.f32 %v2736_v19, %v417_v33  ;;  %v424_v39 = vmul.f32 %v2738_v34, %v352_v22  ;;  %vm430_vm3 = vweird.f32 %v2738_v34 }
 0x247   :  { %v465_v40 = vpack.c.bf16 %v3125_v43, %v3122_v37  ;;  %vm431_vm5 = vmor %vm429_vm4, %vm430_vm3  ;;  %v539_v31 = vperm.slane %v3220_v30, 0 }
 0x248   :  { %v425_v48 = vmul.f32 %v2738_v34, %v424_v39  ;;  %v422_v41 = vsel %vm421_vm1, %v2736_v19, %v418_v38  ;;  %v532_v38 = vrot.slane %v3220_v30, 1  ;;  %v533_v39 = vrot.slane %v3220_v30, 2 }
 0x249   :  { %2538 = vmatmul.msk.bf16.gmra.mxu2 %vm257_vm9, %v465_v40  ;;  %v439_v45 = vmul.f32 %v422_v41, %v3051_v53  ;;  %v2713_v53 = vld [vmem:[%s3955_s7] ss:$0 sm:$0xff]  ;;  %s2880_s7 = smov 64  }
 0x24a   :  { %v426_v42 = vmul.f32 0.5, %v425_v48  ;;  %v3228_v40 = vperm.slane %v532_v38, 0  ;;  %v3230_v41 = vperm.slane %v533_v39, 0 }
 0x24b   :  { %v450_v50 = vmul.f32 %v3082_v51, %v439_v45 }
 0x24c   :  { %v427_v44 = vsub.f32 1.5, %v426_v42 }
 0x24d   :  { %v3135_v54 = vadd.f32 %v3090_v60, %v450_v50 }
 0x24e   :  { %v428_v46 = vmul.f32 %v2738_v34, %v427_v44 }
 0x250   :  { %v432_v47 = vsel %vm431_vm5, %v2738_v34, %v428_v46 }
 0x251   :  { %v440_v49 = vmul.f32 %v432_v47, %v3057_v58  ;;  %v534_v47 = vrot.slane %v3220_v30, 3 }
 0x253   :  { %v451_v52 = vmul.f32 %v3082_v51, %v440_v49  ;;  %v535_v49 = vrot.slane %v3220_v30, 4 }
 0x255   :  { %v3138_v55 = vadd.f32 %v3090_v60, %v451_v52  ;;  %v3241_v52 = vperm.slane %v534_v47, 0 }
 0x257   :  { %v466_v23 = vpack.c.bf16 %v3138_v55, %v3135_v54 }
 0x259   :  { %2539 = vmatmul.msk.bf16.gmra.mxu2 %vm257_vm9, %v466_v23  ;;  %v3243_v23 = vperm.slane %v535_v49, 0 }
 0x2b7   :  { %v508_v58 = vpop.f32.mrf.mxu1 }
 0x2b8   :  { %v3146_v56 = vadd.f32 %v2713_v53, %v508_v58 }
 0x2ba   :  { %556 = vrot.lane.b32.xlu2 %v3146_v56, %s2879_s19 }
 0x2bc   :  { %v513_v51 = vpop.f32.mrf.mxu2 }
 0x2bd   :  { %v3150_v28 = vadd.f32 %v2713_v53, %v513_v51 }
 0x2bf   :  { %v510_v57 = vpop.f32.mrf.mxu1  ;;  %611 = vrot.lane.b32.xlu0 %v3150_v28, %s2879_s19 }
 0x2c0   :  { %v3154_v59 = vadd.f32 %v2713_v53, %v510_v57 }
 0x2c2   :  { %584 = vrot.lane.b32.xlu1 %v3154_v59, %s2879_s19  ;;  %v3183_v35 = vpack.i.bf16 %v3154_v59, %v3146_v56 }
 0x2c4   :  { %v515_v60 = vpop.f32.mrf.mxu2 }
 0x2c5   :  { %v3158_v61 = vadd.f32 %v2713_v53, %v515_v60 }
 0x2c7   :  { %638 = vrot.lane.b32.xlu0 %v3158_v61, %s2879_s19  ;;  %v2666_v36 = vpack.i.bf16 %v3158_v61, %v3150_v28 }
 0x2cc   :  { %v518_v62 = vpop.f32.mrf.mxu2 }
 0x2cd   :  { %v3162_v63 = vadd.f32 %v2713_v53, %v518_v62 }
 0x2cf   :  { %665 = vrot.lane.b32.xlu2 %v3162_v63, %s2879_s19 }
 0x2d4   :  { %v520_v0 = vpop.f32.mrf.mxu2 }
 0x2d5   :  { %v3166_v1 = vadd.f32 %v2713_v53, %v520_v0  ;;  %v536_v0 = vrot.slane %v3220_v30, 5 }
 0x2d7   :  { %692 = vrot.lane.b32.xlu1 %v3166_v1, %s2879_s19  ;;  %v3189_v9 = vpack.i.bf16 %v3166_v1, %v3162_v63 }
 0x2dc   :  { %v523_v2 = vpop.f32.mrf.mxu2 }
 0x2dd   :  { %v3170_v3 = vadd.f32 %v2713_v53, %v523_v2  ;;  %v3250_v2 = vperm.slane %v536_v0, 0 }
 0x2df   :  { %2667 = vrot.lane.b32.xlu1 %v2666_v36, %s2880_s7  ;;  %719 = vrot.lane.b32.xlu0 %v3170_v3, %s2879_s19 }
 0x2e4   :  { %v525_v4 = vpop.f32.mrf.mxu2 }
 0x2e5   :  { %v3177_v5 = vadd.f32 %v2713_v53, %v525_v4 }
 0x2e7   :  { %746 = vrot.lane.b32.xlu2 %v3177_v5, %s2879_s19 }
 0x2ef   :  { %2662 = vrot.lane.b32.xlu2 %v3183_v35, %s2880_s7 }
 0x2f7   :  { %2672 = vrot.lane.b32.xlu2 %v3189_v9, %s2880_s7 }
 0x314   :  { %v557_v11 = vpop.permute.xlu2 %556 }
 0x315   :  { %2540 = vmatpush.xpose.msk.msrb.mxu2 %vm558_vm6, %v557_v11  ;;  %v538_v11 = vrot.slane %v3220_v30, 7 }
 0x318   :  { %2541 = vmatmul.msk.f32.vlgmr.msrb.gmra.mxu2 %vm558_vm6, %v3146_v56 }
 0x329   :  { %v666_v13 = vpop.permute.xlu2 %665 }
 0x331   :  { %v612_v12 = vpop.permute.xlu0 %611 }
 0x332   :  { %2544 = vmatpush.xpose.msk.msra.mxu2 %vm558_vm6, %v612_v12 }
 0x334   :  { %v585_v14 = vpop.permute.xlu1 %584 }
 0x335   :  { %2542 = vmatpush.xpose.msk.msrb.mxu1 %vm558_vm6, %v585_v14  ;;  %2545 = vmatmul.msk.f32.vlgmr.msra.gmra.mxu2 %vm558_vm6, %v3150_v28 }
 0x336   :  { %2548 = vmatpush.xpose.msk.msrb.mxu2 %vm558_vm6, %v666_v13  ;;  %v3255_v13 = vperm.slane %v538_v11, 0 }
 0x338   :  { %2543 = vmatmul.msk.f32.vlgmr.msrb.gmra.mxu1 %vm558_vm6, %v3154_v59 }
 0x339   :  { %v639_v15 = vpop.permute.xlu0 %638 }
 0x33a   :  { %2546 = vmatpush.xpose.msk.msra.mxu3 %vm558_vm6, %v639_v15 }
 0x33d   :  { %2547 = vmatmul.msk.f32.vlgmr.msra.gmra.mxu3 %vm558_vm6, %v3158_v61  ;;  %2549 = vmatmul.msk.f32.vlgmr.msrb.gmra.mxu2 %vm558_vm6, %v3162_v63 }
 0x341   :  { %v747_v16 = vpop.permute.xlu2 %746 }
 0x349   :  { %v693_v17 = vpop.permute.xlu1 %692  ;;  %v2663_v18 = vpop.permute.xlu2 %2662 }
 0x34a   :  { %2550 = vmatpush.xpose.msk.msrb.mxu3 %vm558_vm6, %v693_v17  ;;  %v2665_v19 = vunpack.i.h.bf16 %v2663_v18  ;;  %v2664_v22 = vunpack.i.l.bf16 %v2663_v18  ;;  %v537_v17 = vrot.slane %v3220_v30, 6 }
 0x34c   :  { %v3269_v18 = vperm.slane %v537_v17, 0 }
 0x34d   :  { %2551 = vmatmul.msk.f32.vlgmr.msrb.gmra.mxu3 %vm558_vm6, %v3166_v1 }
 0x34e   :  { %2554 = vmatpush.xpose.msk.msra.mxu3 %vm558_vm6, %v747_v16 }
 0x351   :  { %v2668_v21 = vpop.permute.xlu1 %2667  ;;  %v720_v25 = vpop.permute.xlu0 %719 }
 0x352   :  { %908 = vmatpush.msrb.mxu3 %v2665_v19  ;;  %v2670_v24 = vunpack.i.h.bf16 %v2668_v21  ;;  %2552 = vmatpush.xpose.msk.msra.mxu2 %vm558_vm6, %v720_v25  ;;  %v2669_v26 = vunpack.i.l.bf16 %v2668_v21 }
 0x355   :  { %2555 = vmatmul.msk.f32.vlgmr.msra.gmra.mxu3 %vm558_vm6, %v3177_v5  ;;  %2553 = vmatmul.msk.f32.vlgmr.msra.gmra.mxu2 %vm558_vm6, %v3170_v3 }
 0x356   :  { %882 = vmatpush.msrb.mxu2 %v2664_v22  ;;  %960 = vmatpush.msra.mxu3 %v2670_v24 }
 0x358   :  { %934 = vmatpush.msra.mxu2 %v2669_v26 }
 0x39b   :  { %v580_v32 = vpop.f32.mrf.mxu2 }
 0x39c   :  { %v581_v33 = vadd.f32 %v580_v32, %v539_v31  ;;  %v3279_v32 = vpop.permute.xlu2 %2672 }
 0x39e   :  { %v773_v34 = vsel %vm772_vm7, %v581_v33, -inf }
 0x39f   :  { %774 = vmax.xlane.f32.xlu1 %v773_v34 }
 0x3b5   :  { %v607_v48 = vpop.f32.mrf.mxu1 }
 0x3b6   :  { %v3233_v42 = vadd.f32 %v607_v48, %v3228_v40 }
 0x3b8   :  { %v776_v44 = vsel %vm772_vm7, %v3233_v42, -inf  ;;  %v634_v45 = vpop.f32.mrf.mxu2 }
 0x3b9   :  { %777 = vmax.xlane.f32.xlu0 %v776_v44  ;;  %v635_v46 = vadd.f32 %v634_v45, %v3230_v41 }
 0x3bb   :  { %v779_v50 = vsel %vm772_vm7, %v635_v46, -inf }
 0x3bc   :  { %780 = vmax.xlane.f32.xlu2 %v779_v50 }
 0x3c0   :  { %v661_v53 = vpop.f32.mrf.mxu3  ;;  %v688_v58 = vpop.f32.mrf.mxu2 }
 0x3c1   :  { %v662_v51 = vadd.f32 %v661_v53, %v3241_v52  ;;  %v689_v57 = vadd.f32 %v688_v58, %v3243_v23 }
 0x3c3   :  { %v785_v60 = vsel %vm772_vm7, %v689_v57, -inf  ;;  %v782_v62 = vsel %vm772_vm7, %v662_v51, -inf }
 0x3c4   :  { %786 = vmax.xlane.f32.xlu0 %v785_v60  ;;  %783 = vmax.xlane.f32.xlu1 %v782_v62 }
 0x3d0   :  { %v715_v36 = vpop.f32.mrf.mxu3 }
 0x3d1   :  { %v716_v4 = vadd.f32 %v715_v36, %v3250_v2 }
 0x3d3   :  { %v788_v12 = vsel %vm772_vm7, %v716_v4, -inf }
 0x3d4   :  { %789 = vmax.xlane.f32.xlu2 %v788_v12 }
 0x3d8   :  { %v769_v14 = vpop.f32.mrf.mxu3  ;;  %v742_v19 = vpop.f32.mrf.mxu2 }
 0x3d9   :  { %v3258_v15 = vadd.f32 %v769_v14, %v3255_v13  ;;  %v743_v21 = vadd.f32 %v742_v19, %v3269_v18 }
 0x3db   :  { %v794_v16 = vsel %vm772_vm7, %v3258_v15, -inf  ;;  %v791_v22 = vsel %vm772_vm7, %v743_v21, -inf }
 0x3dc   :  { %795 = vmax.xlane.f32.xlu0 %v794_v16 }
 0x3dd   :  { %1043 = vrot.lane.b32.xlu1 %v3177_v5, %s2880_s7 }
 0x3ec   :  { %1017 = vrot.lane.b32.xlu2 %v3170_v3, %s2880_s7 }
 0x3f0   :  { %1071 = vrot.lane.b32.xlu0 %v3146_v56, %s2881_s22 }
 0x407   :  { %792 = vmax.xlane.f32.xlu1 %v791_v22 }
 0x412   :  { %v775_v24 = vpop.xlane.xlu1 %774 }
 0x413   :  { %v797_v25 = vsub.f32 %v581_v33, %v775_v24 }
 0x415   :  { %v805_v26 = vmul.f32 1.442695, %v797_v25 }
 0x417   :  { %2739 = vpow2.f32 %v805_v26 }
 0x41d   :  { %v3273_v27 = vpop.eup %2739 }
 0x41e   :  { %v821_v29 = vsel %vm772_vm7, %v3273_v27, 0.0 }
 0x41f   :  { %822 = vadd.xlane.f32.xlu2 %v821_v29 }
 0x420   :  { %1099 = vrot.lane.b32.xlu1 %v3154_v59, %s2881_s22 }
 0x42c   :  { %v778_v34 = vpop.xlane.xlu0 %777 }
 0x42d   :  { %v798_v44 = vsub.f32 %v3233_v42, %v778_v34 }
 0x42f   :  { %v781_v38 = vpop.xlane.xlu2 %780  ;;  %v807_v53 = vmul.f32 1.442695, %v798_v44 }
 0x430   :  { %v799_v39 = vsub.f32 %v635_v46, %v781_v38 }
 0x432   :  { %v809_v48 = vmul.f32 1.442695, %v799_v39 }
 0x434   :  { %2741 = vpow2.f32 %v809_v48  ;;  %v2674_v48 = vunpack.i.l.bf16 %v3279_v32 }
 0x437   :  { %1069 = vrot.lane.b32.xlu2 %v3146_v56, %s2882_s2  ;;  %v787_v33 = vpop.xlane.xlu0 %786  ;;  %v784_v58 = vpop.xlane.xlu1 %783 }
 0x438   :  { %v801_v45 = vsub.f32 %v689_v57, %v787_v33  ;;  %v800_v46 = vsub.f32 %v662_v51, %v784_v58 }
 0x43a   :  { %v3284_v47 = vpop.eup %2741  ;;  %v813_v49 = vmul.f32 1.442695, %v801_v45  ;;  %v811_v60 = vmul.f32 1.442695, %v800_v46 }
 0x43b   :  { %v827_v50 = vsel %vm772_vm7, %v3284_v47, 0.0 }
 0x43c   :  { %828 = vadd.xlane.f32.xlu0 %v827_v50  ;;  %2743 = vpow2.f32 %v813_v49 }
 0x43d   :  { %2745 = vpow2.f32 %v807_v53 }
 0x43e   :  { %2747 = vpow2.f32 %v811_v60 }
 0x43f   :  { %1097 = vrot.lane.b32.xlu2 %v3154_v59, %s2882_s2 }
 0x442   :  { %v3290_v56 = vpop.eup %2743 }
 0x443   :  { %v833_v42 = vsel %vm772_vm7, %v3290_v56, 0.0  ;;  %v3294_v57 = vpop.eup %2745 }
 0x444   :  { %834 = vadd.xlane.f32.xlu0 %v833_v42  ;;  %v824_v59 = vsel %vm772_vm7, %v3294_v57, 0.0  ;;  %v3300_v51 = vpop.eup %2747  ;;  %v2675_v42 = vunpack.i.h.bf16 %v3279_v32 }
 0x445   :  { %v830_v11 = vsel %vm772_vm7, %v3300_v51, 0.0 }
 0x447   :  { %1153 = vrot.lane.b32.xlu2 %v3158_v61, %s2882_s2  ;;  %v790_v62 = vpop.xlane.xlu2 %789 }
 0x448   :  { %v802_v0 = vsub.f32 %v716_v4, %v790_v62 }
 0x44a   :  { %v815_v36 = vmul.f32 1.442695, %v802_v0  ;;  %825 = vadd.xlane.f32.xlu1 %v824_v59 }
 0x44c   :  { %2749 = vpow2.f32 %v815_v36 }
 0x44f   :  { %1183 = vrot.lane.b32.xlu2 %v3162_v63, %s2881_s22  ;;  %v1044_v14 = vpop.permute.xlu1 %1043  ;;  %v796_v16 = vpop.xlane.xlu0 %795 }
 0x450   :  { %v804_v22 = vsub.f32 %v3258_v15, %v796_v16  ;;  %v1018_v34 = vpop.permute.xlu2 %1017 }
 0x452   :  { %v3306_v12 = vpop.eup %2749  ;;  %831 = vadd.xlane.f32.xlu1 %v830_v11  ;;  %v819_v25 = vmul.f32 1.442695, %v804_v22 }
 0x453   :  { %v836_v4 = vsel %vm772_vm7, %v3306_v12, 0.0 }
 0x454   :  { %837 = vadd.xlane.f32.xlu0 %v836_v4 }
 0x457   :  { %1209 = vrot.lane.b32.xlu2 %v3166_v1, %s2882_s2 }
 0x45f   :  { %1239 = vrot.lane.b32.xlu2 %v3170_v3, %s2881_s22 }
 0x462   :  { %v1072_v33 = vpop.permute.xlu0 %1071 }
 0x46b   :  { %1155 = vrot.lane.b32.xlu1 %v3158_v61, %s2881_s22 }
 0x473   :  { %1125 = vrot.lane.b32.xlu1 %v3150_v28, %s2882_s2 }
 0x47a   :  { %v793_v17 = vpop.xlane.xlu1 %792 }
 0x47b   :  { %v803_v19 = vsub.f32 %v743_v21, %v793_v17  ;;  %1211 = vrot.lane.b32.xlu1 %v3166_v1, %s2881_s22 }
 0x47d   :  { %v817_v24 = vmul.f32 1.442695, %v803_v19 }
 0x47f   :  { %2751 = vpow2.f32 %v817_v24 }
 0x480   :  { %2753 = vpow2.f32 %v819_v25 }
 0x483   :  { %1265 = vrot.lane.b32.xlu1 %v3177_v5, %s2882_s2 }
 0x485   :  { %v2752_v26 = vpop.eup %2751 }
 0x486   :  { %v839_v29 = vsel %vm772_vm7, %v2752_v26, 0.0  ;;  %v2754_v38 = vpop.eup %2753 }
 0x487   :  { %840 = vadd.xlane.f32.xlu0 %v839_v29  ;;  %v842_v21 = vsel %vm772_vm7, %v2754_v38, 0.0 }
 0x48f   :  { %843 = vadd.xlane.f32.xlu0 %v842_v21 }
 0x492   :  { %v823_v39 = vpop.xlane.xlu2 %822  ;;  %v1100_v45 = vpop.permute.xlu1 %1099 }
 0x493   :  { %2755 = vrcp.f32 %v823_v39 }
 0x499   :  { %v2756_v1 = vpop.eup %2755 }
 0x49a   :  { %v853_v15 = vmul.f32 %v2756_v1, %v3273_v27  ;;  %v1070_v32 = vpop.permute.xlu2 %1069 }
 0x49c   :  { %2556 = vmatmul.msk.f32.vlgmr.msrb.gmra.mxu2 %vm772_vm7, %v853_v15 }
 0x49d   :  { %986 = vmatpush.msrb.mxu2 %v2674_v48 }
 0x4a3   :  { %1127 = vrot.lane.b32.xlu0 %v3150_v28, %s2881_s22 }
 0x4ab   :  { %1181 = vrot.lane.b32.xlu0 %v3162_v63, %s2882_s2 }
 0x4af   :  { %v829_v44 = vpop.xlane.xlu0 %828 }
 0x4b0   :  { %2757 = vrcp.f32 %v829_v44 }
 0x4b3   :  { %1267 = vrot.lane.b32.xlu0 %v3177_v5, %s2881_s22 }
 0x4b6   :  { %v2758_v49 = vpop.eup %2757 }
 0x4b7   :  { %v855_v27 = vmul.f32 %v2758_v49, %v3284_v47  ;;  %v835_v50 = vpop.xlane.xlu0 %834 }
 0x4b8   :  { %2759 = vrcp.f32 %v835_v50 }
 0x4b9   :  { %2558 = vmatmul.msk.f32.vlgmr.msra.gmra.mxu2 %vm772_vm7, %v855_v27 }
 0x4ba   :  { %1038 = vmatpush.msra.mxu2 %v1018_v34 }
 0x4bb   :  { %1237 = vrot.lane.b32.xlu0 %v3170_v3, %s2882_s2 }
 0x4bd   :  { %v826_v53 = vpop.xlane.xlu1 %825 }
 0x4be   :  { %2761 = vrcp.f32 %v826_v53  ;;  %v2760_v63 = vpop.eup %2759 }
 0x4bf   :  { %v857_v58 = vmul.f32 %v2760_v63, %v3290_v56 }
 0x4c1   :  { %2560 = vmatmul.msk.f32.vlgmr.msrb.gmra.mxu2 %vm772_vm7, %v857_v58 }
 0x4c2   :  { %2564 = vmatpush.xpose.msk.msrb.mxu2 %vm558_vm6, %v1072_v33 }
 0x4c4   :  { %v2762_v46 = vpop.eup %2761 }
 0x4c5   :  { %v854_v47 = vmul.f32 %v2762_v46, %v3294_v57  ;;  %v832_v60 = vpop.xlane.xlu1 %831  ;;  %v1098_v57 = vpop.permute.xlu2 %1097 }
 0x4c6   :  { %2763 = vrcp.f32 %v832_v60 }
 0x4c7   :  { %2557 = vmatmul.msk.f32.vlgmr.msrb.gmra.mxu3 %vm772_vm7, %v854_v47  ;;  %v838_v62 = vpop.xlane.xlu0 %837 }
 0x4c8   :  { %1012 = vmatpush.msrb.mxu3 %v2675_v42  ;;  %2765 = vrcp.f32 %v838_v62 }
 0x4cc   :  { %v2764_v0 = vpop.eup %2763 }
 0x4cd   :  { %v856_v59 = vmul.f32 %v2764_v0, %v3300_v51  ;;  %v1154_v4 = vpop.permute.xlu2 %1153 }
 0x4ce   :  { %v2766_v56 = vpop.eup %2765 }
 0x4cf   :  { %2559 = vmatmul.msk.f32.vlgmr.msra.gmra.mxu3 %vm772_vm7, %v856_v59  ;;  %v858_v36 = vmul.f32 %v2766_v56, %v3306_v12 }
 0x4d0   :  { %1064 = vmatpush.msra.mxu3 %v1044_v14 }
 0x4d5   :  { %v1184_v51 = vpop.permute.xlu2 %1183 }
 0x4d7   :  { %2561 = vmatmul.msk.f32.vlgmr.msrb.gmra.mxu3 %vm772_vm7, %v858_v36 }
 0x4d8   :  { %2566 = vmatpush.xpose.msk.msrb.mxu3 %vm558_vm6, %v1100_v45 }
 0x4dd   :  { %v1156_v17 = vpop.permute.xlu1 %1155  ;;  %v1210_v25 = vpop.permute.xlu2 %1209 }
 0x4e5   :  { %v1126_v24 = vpop.permute.xlu1 %1125  ;;  %v1240_v34 = vpop.permute.xlu2 %1239 }
 0x4ed   :  { %v1212_v29 = vpop.permute.xlu1 %1211 }
 0x4f5   :  { %v1266_v39 = vpop.permute.xlu1 %1265 }
 0x4fa   :  { %v841_v11 = vpop.xlane.xlu0 %840 }
 0x4fb   :  { %2767 = vrcp.f32 %v841_v11 }
 0x501   :  { %v2768_v16 = vpop.eup %2767 }
 0x502   :  { %v859_v19 = vmul.f32 %v2768_v16, %v2752_v26  ;;  %v844_v22 = vpop.xlane.xlu0 %843 }
 0x503   :  { %2769 = vrcp.f32 %v844_v22 }
 0x504   :  { %2562 = vmatmul.msk.f32.vlgmr.msra.gmra.mxu2 %vm772_vm7, %v859_v19 }
 0x505   :  { %2570 = vmatpush.xpose.msk.msra.mxu2 %vm558_vm6, %v1156_v17 }
 0x509   :  { %v2770_v12 = vpop.eup %2769 }
 0x50a   :  { %v860_v14 = vmul.f32 %v2770_v12, %v2754_v38 }
 0x50c   :  { %2563 = vmatmul.msk.f32.vlgmr.msra.gmra.mxu3 %vm772_vm7, %v860_v14  ;;  %2565 = vmatmul.msk.f32.vlgmr.msrb.gmra.mxu2 %vm558_vm6, %v1070_v32 }
 0x50d   :  { %2572 = vmatpush.xpose.msk.msra.mxu3 %vm558_vm6, %v1184_v51 }
 0x514   :  { %2567 = vmatmul.msk.f32.vlgmr.msrb.gmra.mxu3 %vm558_vm6, %v1098_v57  ;;  %2571 = vmatmul.msk.f32.vlgmr.msra.gmra.mxu2 %vm558_vm6, %v1154_v4 }
 0x515   :  { %v1128_v26 = vpop.permute.xlu0 %1127 }
 0x516   :  { %2568 = vmatpush.xpose.msk.msra.mxu1 %vm558_vm6, %v1128_v26 }
 0x519   :  { %2569 = vmatmul.msk.f32.vlgmr.msra.gmra.mxu1 %vm558_vm6, %v1126_v24 }
 0x51a   :  { %2574 = vmatpush.xpose.msk.msrb.mxu1 %vm558_vm6, %v1212_v29 }
 0x51d   :  { %v1182_v38 = vpop.permute.xlu0 %1181 }
 0x51e   :  { %2576 = vmatpush.xpose.msk.msra.mxu1 %vm558_vm6, %v1240_v34  ;;  %2573 = vmatmul.msk.f32.vlgmr.msra.gmra.mxu3 %vm558_vm6, %v1182_v38 }
 0x51f   :  { %v3365_v15 = vpop.f32.mrf.mxu2 }
 0x521   :  { %2575 = vmatmul.msk.f32.vlgmr.msrb.gmra.mxu1 %vm558_vm6, %v1210_v25 }
 0x525   :  { %v1268_v21 = vpop.permute.xlu0 %1267 }
 0x526   :  { %2578 = vmatpush.xpose.msk.msrb.mxu2 %vm558_vm6, %v1268_v21 }
 0x529   :  { %2579 = vmatmul.msk.f32.vlgmr.msrb.gmra.mxu2 %vm558_vm6, %v1266_v39 }
 0x52d   :  { %v1238_v1 = vpop.permute.xlu0 %1237 }
 0x52e   :  { %2577 = vmatmul.msk.f32.vlgmr.msra.gmra.mxu1 %vm558_vm6, %v1238_v1 }
 0x53c   :  { %v3369_v33 = vpop.f32.mrf.mxu2 }
 0x544   :  { %v3373_v45 = vpop.f32.mrf.mxu2 }
 0x54a   :  { %v3367_v48 = vpop.f32.mrf.mxu3 }
 0x552   :  { %v3371_v44 = vpop.f32.mrf.mxu3 }
 0x55a   :  { %v3375_v49 = vpop.f32.mrf.mxu3 }
 0x587   :  { %v3377_v27 = vpop.f32.mrf.mxu2 }
 0x58f   :  { %v3379_v50 = vpop.f32.mrf.mxu3  ;;  %v1094_v53 = vpop.f32.mrf.mxu2 }
 0x590   :  { %v1095_v63 = vadd.f32 %v1094_v53, %v539_v31 }
 0x592   :  { %v1293_v58 = vsel %vm772_vm7, %v1095_v63, -inf }
 0x593   :  { %1294 = vmax.xlane.f32.xlu1 %v1293_v58 }
 0x596   :  { %v1150_v46 = vpop.f32.mrf.mxu1 }
 0x597   :  { %v1151_v47 = vadd.f32 %v1150_v46, %v3230_v41  ;;  %v1122_v60 = vpop.f32.mrf.mxu3  ;;  %v1178_v42 = vpop.f32.mrf.mxu2 }
 0x598   :  { %v1123_v62 = vadd.f32 %v1122_v60, %v3228_v40  ;;  %v1179_v0 = vadd.f32 %v1178_v42, %v3241_v52 }
 0x599   :  { %v1299_v59 = vsel %vm772_vm7, %v1151_v47, -inf }
 0x59a   :  { %v1302_v56 = vsel %vm772_vm7, %v1179_v0, -inf  ;;  %v1296_v36 = vsel %vm772_vm7, %v1123_v62, -inf }
 0x59b   :  { %1303 = vmax.xlane.f32.xlu0 %v1302_v56  ;;  %1297 = vmax.xlane.f32.xlu2 %v1296_v36  ;;  %v2681_v36 = vpack.i.bf16 %v3150_v28, %v3158_v61 }
 0x59c   :  { %1300 = vmax.xlane.f32.xlu1 %v1299_v59 }
 0x59e   :  { %v1234_v30 = vpop.f32.mrf.mxu1 }
 0x59f   :  { %v1235_v31 = vadd.f32 %v1234_v30, %v3250_v2 }
 0x5a1   :  { %v1206_v32 = vpop.f32.mrf.mxu3  ;;  %v1308_v41 = vsel %vm772_vm7, %v1235_v31, -inf }
 0x5a2   :  { %v1207_v57 = vadd.f32 %v1206_v32, %v3243_v23 }
 0x5a3   :  { %1309 = vmax.xlane.f32.xlu0 %v1308_v41 }
 0x5a4   :  { %v1305_v40 = vsel %vm772_vm7, %v1207_v57, -inf }
 0x5a5   :  { %1306 = vmax.xlane.f32.xlu2 %v1305_v40 }
 0x5ab   :  { %v1262_v52 = vpop.f32.mrf.mxu1 }
 0x5ac   :  { %v1263_v11 = vadd.f32 %v1262_v52, %v3269_v18  ;;  %v1290_v21 = vpop.f32.mrf.mxu2 }
 0x5ad   :  { %v1291_v53 = vadd.f32 %v1290_v21, %v3255_v13 }
 0x5ae   :  { %v1311_v4 = vsel %vm772_vm7, %v1263_v11, -inf }
 0x5af   :  { %1312 = vmax.xlane.f32.xlu0 %v1311_v4  ;;  %v1314_v42 = vsel %vm772_vm7, %v1291_v53, -inf }
 0x5bd   :  { %2677 = vrot.lane.b32.xlu2 %v3183_v35, %s2883_s23 }
 0x606   :  { %v1295_v2 = vpop.xlane.xlu1 %1294 }
 0x607   :  { %v1317_v16 = vsub.f32 %v1095_v63, %v1295_v2 }
 0x609   :  { %v1325_v17 = vmul.f32 1.442695, %v1317_v16 }
 0x60b   :  { %2771 = vpow2.f32 %v1325_v17 }
 0x60e   :  { %v1304_v19 = vpop.xlane.xlu0 %1303  ;;  %v1298_v51 = vpop.xlane.xlu2 %1297 }
 0x60f   :  { %v1301_v23 = vpop.xlane.xlu1 %1300  ;;  %v1320_v22 = vsub.f32 %v1179_v0, %v1304_v19  ;;  %v1318_v35 = vsub.f32 %v1123_v62, %v1298_v51 }
 0x610   :  { %v1319_v12 = vsub.f32 %v1151_v47, %v1301_v23 }
 0x611   :  { %v2772_v14 = vpop.eup %2771  ;;  %v1331_v24 = vmul.f32 1.442695, %v1320_v22  ;;  %v1327_v1 = vmul.f32 1.442695, %v1318_v35 }
 0x612   :  { %v1329_v25 = vmul.f32 1.442695, %v1319_v12  ;;  %v1341_v18 = vsel %vm772_vm7, %v2772_v14, 0.0 }
 0x613   :  { %1342 = vadd.xlane.f32.xlu2 %v1341_v18 }
 0x614   :  { %2773 = vpow2.f32 %v1329_v25 }
 0x615   :  { %2775 = vpow2.f32 %v1331_v24 }
 0x616   :  { %v1310_v63 = vpop.xlane.xlu0 %1309  ;;  %2777 = vpow2.f32 %v1327_v1 }
 0x617   :  { %v1322_v60 = vsub.f32 %v1235_v31, %v1310_v63 }
 0x618   :  { %v1307_v26 = vpop.xlane.xlu2 %1306 }
 0x619   :  { %v1335_v62 = vmul.f32 1.442695, %v1322_v60  ;;  %v1321_v59 = vsub.f32 %v1207_v57, %v1307_v26 }
 0x61a   :  { %v3399_v29 = vpop.eup %2773 }
 0x61b   :  { %v3401_v34 = vpop.eup %2775  ;;  %v1347_v38 = vsel %vm772_vm7, %v3399_v29, 0.0  ;;  %2779 = vpow2.f32 %v1335_v62  ;;  %v1333_v56 = vmul.f32 1.442695, %v1321_v59 }
 0x61c   :  { %1348 = vadd.xlane.f32.xlu1 %v1347_v38  ;;  %v1350_v39 = vsel %vm772_vm7, %v3401_v34, 0.0  ;;  %v2778_v0 = vpop.eup %2777 }
 0x61d   :  { %1351 = vadd.xlane.f32.xlu0 %v1350_v39  ;;  %v1344_v13 = vsel %vm772_vm7, %v2778_v0, 0.0  ;;  %2781 = vpow2.f32 %v1333_v56 }
 0x620   :  { %v2678_v58 = vpop.permute.xlu2 %2677 }
 0x621   :  { %v2680_v46 = vunpack.i.h.bf16 %v2678_v58  ;;  %v2679_v47 = vunpack.i.l.bf16 %v2678_v58  ;;  %v2780_v30 = vpop.eup %2779 }
 0x622   :  { %v1356_v31 = vsel %vm772_vm7, %v2780_v30, 0.0  ;;  %v1313_v41 = vpop.xlane.xlu0 %1312 }
 0x623   :  { %1402 = vmatpush.msrb.mxu3 %v2679_v47  ;;  %1428 = vmatpush.msrb.mxu1 %v2680_v46  ;;  %v2782_v32 = vpop.eup %2781  ;;  %v1323_v57 = vsub.f32 %v1263_v11, %v1313_v41 }
 0x624   :  { %1315 = vmax.xlane.f32.xlu1 %v1314_v42 }
 0x625   :  { %v1337_v40 = vmul.f32 1.442695, %v1323_v57 }
 0x627   :  { %2783 = vpow2.f32 %v1337_v40 }
 0x62b   :  { %2687 = vrot.lane.b32.xlu2 %v3189_v9, %s2883_s23  ;;  %v1353_v9 = vsel %vm772_vm7, %v2782_v32, 0.0 }
 0x62c   :  { %1345 = vadd.xlane.f32.xlu1 %v1344_v13 }
 0x62d   :  { %v3419_v52 = vpop.eup %2783 }
 0x62e   :  { %v1359_v28 = vsel %vm772_vm7, %v3419_v52, 0.0 }
 0x631   :  { %2682 = vrot.lane.b32.xlu0 %v2681_v36, %s2883_s23 }
 0x633   :  { %1563 = vrot.lane.b32.xlu2 %v3177_v5, %s2883_s23 }
 0x634   :  { %1357 = vadd.xlane.f32.xlu1 %v1356_v31 }
 0x63c   :  { %1354 = vadd.xlane.f32.xlu1 %v1353_v9 }
 0x65b   :  { %1360 = vadd.xlane.f32.xlu0 %v1359_v28 }
 0x686   :  { %v1343_v61 = vpop.xlane.xlu2 %1342 }
 0x687   :  { %2785 = vrcp.f32 %v1343_v61 }
 0x68d   :  { %v2786_v5 = vpop.eup %2785 }
 0x68e   :  { %v1373_v4 = vmul.f32 %v2786_v5, %v2772_v14  ;;  %v2688_v2 = vpop.permute.xlu2 %2687  ;;  %v2638_v5 = vld [vmem:[%s3956_s8] sm:$0xff] }
 0x68f   :  { %v1349_v16 = vpop.xlane.xlu1 %1348  ;;  %v2689_v17 = vunpack.i.l.bf16 %v2688_v2  ;;  %v2690_v19 = vunpack.i.h.bf16 %v2688_v2 }
 0x690   :  { %2580 = vmatmul.msk.f32.vlgmr.msrb.gmra.mxu3 %vm772_vm7, %v1373_v4  ;;  %v1352_v23 = vpop.xlane.xlu0 %1351 }
 0x691   :  { %1506 = vmatpush.msra.mxu3 %v2689_v17  ;;  %1532 = vmatpush.msrb.mxu0 %v2690_v19  ;;  %2787 = vrcp.f32 %v1352_v23 }
 0x696   :  { %v1564_v39 = vpop.permute.xlu2 %1563 }
 0x697   :  { %v1316_v11 = vpop.xlane.xlu1 %1315  ;;  %v2788_v24 = vpop.eup %2787 }
 0x698   :  { %v1324_v22 = vsub.f32 %v1291_v53, %v1316_v11  ;;  %v1376_v38 = vmul.f32 %v2788_v24, %v3401_v34 }
 0x69a   :  { %v1339_v51 = vmul.f32 1.442695, %v1324_v22 }
 0x69c   :  { %2789 = vpow2.f32 %v1339_v51 }
 0x69f   :  { %v1346_v12 = vpop.xlane.xlu1 %1345 }
 0x6a0   :  { %2791 = vrcp.f32 %v1346_v12 }
 0x6a1   :  { %2793 = vrcp.f32 %v1349_v16 }
 0x6a2   :  { %v2790_v25 = vpop.eup %2789 }
 0x6a3   :  { %v2683_v18 = vpop.permute.xlu0 %2682  ;;  %v1362_v14 = vsel %vm772_vm7, %v2790_v25, 0.0 }
 0x6a4   :  { %v2685_v26 = vunpack.i.h.bf16 %v2683_v18  ;;  %v2684_v35 = vunpack.i.l.bf16 %v2683_v18  ;;  %1363 = vadd.xlane.f32.xlu1 %v1362_v14 }
 0x6a6   :  { %v2792_v21 = vpop.eup %2791  ;;  %1454 = vmatpush.msra.mxu1 %v2685_v26  ;;  %1480 = vmatpush.msra.mxu2 %v2684_v35 }
 0x6a7   :  { %v1374_v1 = vmul.f32 %v2792_v21, %v2778_v0  ;;  %2583 = vmatmul.msk.f32.vlgmr.msra.gmra.mxu2 %vm772_vm7, %v1376_v38  ;;  %v1358_v53 = vpop.xlane.xlu1 %1357  ;;  %v2794_v63 = vpop.eup %2793 }
 0x6a8   :  { %1584 = vmatpush.msrb.mxu2 %v1564_v39  ;;  %2795 = vrcp.f32 %v1358_v53  ;;  %v1375_v46 = vmul.f32 %v2794_v63, %v3399_v29  ;;  %v2639_v29 = vld [vmem:[%s3956_s8 + $0x8] sm:$0xff]  ;;  %s2489_s8 = sshll.u32 %s2886_s27, 4  ;;  %s2490_s8 = int_to_ptr.vmem [resolvable:$true] %s2489_s8 }
 0x6a9   :  { %2581 = vmatmul.msk.f32.vlgmr.msrb.gmra.mxu1 %vm772_vm7, %v1374_v1  ;;  %1671 = vmatpush.bf16.msrb.mxu3 %v2639_v29 }
 0x6ad   :  { %1672 = vmatpush.bf16.msrb.mxu3 %v2638_v5 }
 0x6ae   :  { %v2796_v58 = vpop.eup %2795 }
 0x6af   :  { %v1355_v47 = vpop.xlane.xlu1 %1354  ;;  %v1378_v60 = vmul.f32 %v2796_v58, %v2780_v30 }
 0x6b0   :  { %2797 = vrcp.f32 %v1355_v47 }
 0x6b1   :  { %2582 = vmatmul.msk.f32.vlgmr.msra.gmra.mxu1 %vm772_vm7, %v1375_v46  ;;  %2585 = vmatmul.msk.f32.vlgmr.msrb.gmra.mxu0 %vm772_vm7, %v1378_v60 }
 0x6b6   :  { %v2798_v34 = vpop.eup %2797 }
 0x6b7   :  { %v1377_v42 = vmul.f32 %v2798_v34, %v2782_v32 }
 0x6b9   :  { %2584 = vmatmul.msk.f32.vlgmr.msra.gmra.mxu3 %vm772_vm7, %v1377_v42 }
 0x6bd   :  { %1537 = vrot.lane.b32.xlu1 %v3170_v3, %s2883_s23 }
 0x6ce   :  { %v1361_v13 = vpop.xlane.xlu0 %1360 }
 0x713   :  { %v1404_v56 = vpop.f32.mrf.mxu3 }
 0x717   :  { %v1364_v62 = vpop.xlane.xlu1 %1363 }
 0x718   :  { %2799 = vrcp.f32 %v1364_v62 }
 0x719   :  { %2801 = vrcp.f32 %v1361_v13 }
 0x71e   :  { %v2800_v0 = vpop.eup %2799 }
 0x71f   :  { %v1380_v59 = vmul.f32 %v2800_v0, %v2790_v25  ;;  %v2802_v3 = vpop.eup %2801 }
 0x720   :  { %v1379_v9 = vmul.f32 %v2802_v3, %v3419_v52 }
 0x721   :  { %2587 = vmatmul.msk.f32.vlgmr.msrb.gmra.mxu2 %vm772_vm7, %v1380_v59 }
 0x726   :  { %v1430_v36 = vpop.f32.mrf.mxu1 }
 0x727   :  { %v2691_v30 = vpack.i.bf16 %v1430_v36, %v1404_v56 }
 0x729   :  { %2692 = vrot.lane.b32.xlu2 %v2691_v30, %s2884_s3 }
 0x72a   :  { %v1482_v31 = vpop.f32.mrf.mxu2 }
 0x72e   :  { %v1456_v32 = vpop.f32.mrf.mxu1  ;;  %v1534_v40 = vpop.f32.mrf.mxu0 }
 0x72f   :  { %v2696_v41 = vpack.i.bf16 %v1482_v31, %v1456_v32  ;;  %v1538_v57 = vpop.permute.xlu1 %1537 }
 0x730   :  { %1558 = vmatpush.msrb.mxu1 %v1538_v57 }
 0x731   :  { %2586 = vmatmul.msk.f32.vlgmr.msrb.gmra.mxu1 %vm772_vm7, %v1379_v9  ;;  %2697 = vrot.lane.b32.xlu2 %v2696_v41, %s2884_s3 }
 0x73c   :  { %v1508_v28 = vpop.f32.mrf.mxu3 }
 0x73d   :  { %v2701_v61 = vpack.i.bf16 %v1534_v40, %v1508_v28 }
 0x73f   :  { %2702 = vrot.lane.b32.xlu2 %v2701_v61, %s2884_s3 }
 0x783   :  { %v2693_v4 = vpop.permute.xlu2 %2692 }
 0x784   :  { %v2695_v2 = vunpack.i.h.bf16 %v2693_v4  ;;  %v2694_v52 = vunpack.i.l.bf16 %v2693_v4 }
 0x786   :  { %v1622_v16 = vsel %vm558_vm6, %v3367_v48, %v2695_v2  ;;  %v1621_v17 = vsel %vm558_vm6, %v3365_v15, %v2694_v52 }
 0x787   :  { %v1629_v19 = vpack.c.bf16 %v1622_v16, %v1621_v17 }
 0x789   :  { %2596 = vmatmul.msk.bf16.vlgmr.msrb.gmra.mxu3 %vm257_vm9, %v1629_v19 }
 0x78b   :  { %v2698_v11 = vpop.permute.xlu2 %2697 }
 0x78c   :  { %v2700_v23 = vunpack.i.h.bf16 %v2698_v11  ;;  %v2699_v22 = vunpack.i.l.bf16 %v2698_v11 }
 0x78e   :  { %v1623_v51 = vsel %vm558_vm6, %v3369_v33, %v2699_v22  ;;  %v1624_v12 = vsel %vm558_vm6, %v3371_v44, %v2700_v23  ;;  %v3465_v44 = vld [vmem:[%s3957_s9] ss:$0 sm:$0xff] }
 0x78f   :  { %v1630_v24 = vpack.c.bf16 %v1624_v12, %v1623_v51 }
 0x799   :  { %2597 = vmatmul.msk.bf16.gmra.mxu3 %vm257_vm9, %v1630_v24  ;;  %v2703_v25 = vpop.permute.xlu2 %2702 }
 0x79a   :  { %v2705_v48 = vunpack.i.h.bf16 %v2703_v25  ;;  %v2704_v18 = vunpack.i.l.bf16 %v2703_v25 }
 0x79c   :  { %v1625_v15 = vsel %vm558_vm6, %v3373_v45, %v2704_v18  ;;  %v1626_v14 = vsel %vm558_vm6, %v3375_v49, %v2705_v48 }
 0x79d   :  { %v1631_v26 = vpack.c.bf16 %v1626_v14, %v1625_v15 }
 0x7a4   :  { %v1586_v35 = vpop.f32.mrf.mxu2 }
 0x7a9   :  { %2598 = vmatmul.msk.bf16.gmra.mxu3 %vm257_vm9, %v1631_v26 }
 0x7ae   :  { %v1560_v33 = vpop.f32.mrf.mxu1 }
 0x7af   :  { %v2706_v38 = vpack.i.bf16 %v1586_v35, %v1560_v33 }
 0x7b1   :  { %2707 = vrot.lane.b32.xlu1 %v2706_v38, %s2884_s3 }
 0x80c   :  { %v1674_v21 = vpop.f32.mrf.mxu3 }
 0x80d   :  { %v1675_v39 = vadd.f32 %v3465_v44, %v1674_v21 }
 0x80f   :  { %v1694_v45 = vadd.f32 %v1675_v39, %v3098_v6 }
 0x811   :  { %v1704_v49 = vsel %vm257_vm9, %v1694_v45, 0.0 }
 0x812   :  { %1705 = vadd.xlane.f32.xlu2 %v1704_v49 }
 0x814   :  { %v1676_v1 = vpop.f32.mrf.mxu3 }
 0x815   :  { %v1677_v53 = vadd.f32 %v3465_v44, %v1676_v1 }
 0x817   :  { %v1695_v63 = vadd.f32 %v1677_v53, %v3107_v10 }
 0x819   :  { %v1707_v58 = vsel %vm257_vm9, %v1695_v63, 0.0 }
 0x81a   :  { %1708 = vadd.xlane.f32.xlu1 %v1707_v58 }
 0x81c   :  { %v1679_v46 = vpop.f32.mrf.mxu3 }
 0x81d   :  { %v1680_v47 = vadd.f32 %v3465_v44, %v1679_v46 }
 0x81f   :  { %v1696_v60 = vadd.f32 %v1680_v47, %v3101_v7  ;;  %v2640_v47 = vld [vmem:[%s3960_s12] sm:$0xff] }
 0x821   :  { %v1710_v34 = vsel %vm257_vm9, %v1696_v60, 0.0 }
 0x822   :  { %1711 = vadd.xlane.f32.xlu0 %v1710_v34 }
 0x823   :  { %v2708_v6 = vpop.permute.xlu1 %2707 }
 0x824   :  { %v2710_v42 = vunpack.i.h.bf16 %v2708_v6  ;;  %v2709_v62 = vunpack.i.l.bf16 %v2708_v6  ;;  %v1681_v0 = vpop.f32.mrf.mxu3 }
 0x825   :  { %v1682_v59 = vadd.f32 %v3465_v44, %v1681_v0 }
 0x826   :  { %v1627_v10 = vsel %vm558_vm6, %v3377_v27, %v2709_v62  ;;  %v1628_v29 = vsel %vm558_vm6, %v3379_v50, %v2710_v42 }
 0x827   :  { %v1632_v13 = vpack.c.bf16 %v1628_v29, %v1627_v10  ;;  %v1697_v56 = vadd.f32 %v1682_v59, %v3104_v8 }
 0x829   :  { %2599 = vmatmul.msk.bf16.gmra.mxu3 %vm257_vm9, %v1632_v13  ;;  %v1713_v7 = vsel %vm257_vm9, %v1697_v56, 0.0 }
 0x82a   :  { %1714 = vadd.xlane.f32.xlu0 %v1713_v7 }
 0x82c   :  { %v1684_v36 = vpop.f32.mrf.mxu3 }
 0x82d   :  { %v1685_v30 = vadd.f32 %v3465_v44, %v1684_v36 }
 0x82f   :  { %v1698_v3 = vadd.f32 %v1685_v30, %v3122_v37 }
 0x831   :  { %v1716_v31 = vsel %vm257_vm9, %v1698_v3, 0.0 }
 0x832   :  { %1717 = vadd.xlane.f32.xlu0 %v1716_v31 }
 0x834   :  { %v1686_v27 = vpop.f32.mrf.mxu3 }
 0x835   :  { %v1687_v32 = vadd.f32 %v3465_v44, %v1686_v27 }
 0x837   :  { %v1699_v50 = vadd.f32 %v1687_v32, %v3125_v43  ;;  %v3550_v32 = vld [vmem:[%s3958_s10] ss:$0 sm:$0xff] }
 0x839   :  { %v1719_v8 = vsel %vm257_vm9, %v1699_v50, 0.0 }
 0x83a   :  { %1720 = vadd.xlane.f32.xlu0 %v1719_v8 }
 0x885   :  { %v1706_v9 = vpop.xlane.xlu2 %1705 }
 0x886   :  { %v1728_v41 = vmul.f32 %v1706_v9, %v3012_v20 }
 0x888   :  { %v3491_v57 = vsub.f32 %v1694_v45, %v1728_v41 }
 0x88a   :  { %v1744_v40 = vmul.f32 %v3491_v57, %v3491_v57 }
 0x88c   :  { %v1752_v37 = vsel %vm257_vm9, %v1744_v40, 0.0  ;;  %v3556_v40 = vld [vmem:[%s3959_s11] ss:$0 sm:$0xff] }
 0x88d   :  { %1753 = vadd.xlane.f32.xlu0 %v1752_v37  ;;  %v1709_v28 = vpop.xlane.xlu1 %1708 }
 0x88e   :  { %v1729_v61 = vmul.f32 %v1709_v28, %v3012_v20 }
 0x890   :  { %v3497_v5 = vsub.f32 %v1695_v63, %v1729_v61 }
 0x892   :  { %v1745_v43 = vmul.f32 %v3497_v5, %v3497_v5 }
 0x894   :  { %v1755_v4 = vsel %vm257_vm9, %v1745_v43, 0.0 }
 0x895   :  { %v1712_v2 = vpop.xlane.xlu0 %1711  ;;  %1756 = vadd.xlane.f32.xlu2 %v1755_v4 }
 0x896   :  { %v1730_v52 = vmul.f32 %v1712_v2, %v3012_v20 }
 0x898   :  { %v3503_v16 = vsub.f32 %v1696_v60, %v1730_v52 }
 0x89a   :  { %v1746_v17 = vmul.f32 %v3503_v16, %v3503_v16 }
 0x89c   :  { %v1758_v19 = vsel %vm257_vm9, %v1746_v17, 0.0 }
 0x89d   :  { %v1715_v11 = vpop.xlane.xlu0 %1714  ;;  %1759 = vadd.xlane.f32.xlu2 %v1758_v19 }
 0x89e   :  { %v1731_v51 = vmul.f32 %v1715_v11, %v3012_v20 }
 0x8a0   :  { %v3516_v15 = vsub.f32 %v1697_v56, %v1731_v51 }
 0x8a5   :  { %v1718_v23 = vpop.xlane.xlu0 %1717 }
 0x8a6   :  { %v1732_v38 = vmul.f32 %v1718_v23, %v3012_v20 }
 0x8a8   :  { %v3530_v45 = vsub.f32 %v1698_v3, %v1732_v38 }
 0x8aa   :  { %v1748_v53 = vmul.f32 %v3530_v45, %v3530_v45 }
 0x8ac   :  { %v1689_v22 = vpop.f32.mrf.mxu3 }
 0x8ad   :  { %v1690_v12 = vadd.f32 %v3465_v44, %v1689_v22  ;;  %v1721_v24 = vpop.xlane.xlu0 %1720 }
 0x8ae   :  { %v1733_v25 = vmul.f32 %v1721_v24, %v3012_v20 }
 0x8af   :  { %v3512_v48 = vadd.f32 %v1690_v12, %v3135_v54  ;;  %v1747_v54 = vmul.f32 %v3516_v15, %v3516_v15 }
 0x8b0   :  { %v3514_v18 = vsub.f32 %v1699_v50, %v1733_v25 }
 0x8b1   :  { %v1722_v14 = vsel %vm257_vm9, %v3512_v48, 0.0  ;;  %v1761_v1 = vsel %vm257_vm9, %v1747_v54, 0.0 }
 0x8b2   :  { %1723 = vadd.xlane.f32.xlu1 %v1722_v14  ;;  %v1749_v26 = vmul.f32 %v3514_v18, %v3514_v18 }
 0x8b4   :  { %v1691_v35 = vpop.f32.mrf.mxu3  ;;  %v1767_v33 = vsel %vm257_vm9, %v1749_v26, 0.0 }
 0x8b5   :  { %v1692_v21 = vadd.f32 %v3465_v44, %v1691_v35  ;;  %1768 = vadd.xlane.f32.xlu2 %v1767_v33  ;;  %v1764_v44 = vsel %vm257_vm9, %v1748_v53, 0.0 }
 0x8b7   :  { %v3528_v39 = vadd.f32 %v1692_v21, %v3138_v55  ;;  %v2641_v55 = vld [vmem:[%s3960_s12 + $0x8] sm:$0xff] }
 0x8b8   :  { %1944 = vmatpush.bf16.msra.mxu0 %v2641_v55 }
 0x8b9   :  { %v1725_v49 = vsel %vm257_vm9, %v3528_v39, 0.0 }
 0x8ba   :  { %1726 = vadd.xlane.f32.xlu0 %v1725_v49  ;;  %1762 = vadd.xlane.f32.xlu1 %v1761_v1 }
 0x8bc   :  { %1945 = vmatpush.bf16.msra.mxu0 %v2640_v47 }
 0x8c2   :  { %1765 = vadd.xlane.f32.xlu0 %v1764_v44 }
 0x900   :  { %v1754_v63 = vpop.xlane.xlu0 %1753 }
 0x901   :  { %v1776_v58 = vmul.f32 %v1754_v63, %v3012_v20 }
 0x903   :  { %v1784_v46 = vadd.f32 1e-12, %v1776_v58 }
 0x905   :  { %2803 = vrsqrt.f32 %v1784_v46  ;;  %vm1798_vm10 = vweird.f32 %v1784_v46 }
 0x908   :  { %v1757_v60 = vpop.xlane.xlu2 %1756 }
 0x909   :  { %v1777_v34 = vmul.f32 %v1757_v60, %v3012_v20 }
 0x90b   :  { %v2804_v6 = vpop.eup %2803  ;;  %v1785_v42 = vadd.f32 1e-12, %v1777_v34 }
 0x90c   :  { %v1793_v62 = vmul.f32 %v2804_v6, %v1784_v46  ;;  %vm1799_vm8 = vweird.f32 %v2804_v6 }
 0x90d   :  { %2805 = vrsqrt.f32 %v1785_v42  ;;  %vm1800_vm11 = vmor %vm1798_vm10, %vm1799_vm8  ;;  %vm1808_vm13 = vweird.f32 %v1785_v42 }
 0x90e   :  { %v1794_v0 = vmul.f32 %v2804_v6, %v1793_v62 }
 0x910   :  { %v1795_v59 = vmul.f32 0.5, %v1794_v0  ;;  %v1760_v7 = vpop.xlane.xlu2 %1759 }
 0x911   :  { %v1778_v31 = vmul.f32 %v1760_v7, %v3012_v20 }
 0x912   :  { %v1796_v10 = vsub.f32 1.5, %v1795_v59 }
 0x913   :  { %v2806_v29 = vpop.eup %2805  ;;  %v1786_v9 = vadd.f32 1e-12, %v1778_v31 }
 0x914   :  { %v1797_v13 = vmul.f32 %v2804_v6, %v1796_v10  ;;  %v1803_v56 = vmul.f32 %v2806_v29, %v1785_v42  ;;  %vm1809_vm12 = vweird.f32 %v2806_v29 }
 0x915   :  { %vm1810_vm14 = vmor %vm1808_vm13, %vm1809_vm12  ;;  %2807 = vrsqrt.f32 %v1786_v9  ;;  %vm1818_vm0 = vweird.f32 %v1786_v9 }
 0x916   :  { %v1804_v36 = vmul.f32 %v2806_v29, %v1803_v56  ;;  %v1801_v30 = vsel %vm1800_vm11, %v2804_v6, %v1797_v13 }
 0x917   :  { %v1872_v50 = vmul.f32 %v1801_v30, %v3491_v57 }
 0x918   :  { %v1805_v3 = vmul.f32 0.5, %v1804_v36 }
 0x919   :  { %v1883_v37 = vmul.f32 %v3550_v32, %v1872_v50 }
 0x91a   :  { %v1806_v27 = vsub.f32 1.5, %v1805_v3 }
 0x91b   :  { %v3562_v43 = vadd.f32 %v3556_v40, %v1883_v37  ;;  %v2808_v52 = vpop.eup %2807 }
 0x91c   :  { %v1807_v8 = vmul.f32 %v2806_v29, %v1806_v27  ;;  %v1813_v11 = vmul.f32 %v2808_v52, %v1786_v9  ;;  %vm1819_vm15 = vweird.f32 %v2808_v52 }
 0x91d   :  { %vm1820_vm1 = vmor %vm1818_vm0, %vm1819_vm15 }
 0x91e   :  { %v1811_v41 = vsel %vm1810_vm14, %v2806_v29, %v1807_v8  ;;  %v1814_v24 = vmul.f32 %v2808_v52, %v1813_v11 }
 0x91f   :  { %v1873_v28 = vmul.f32 %v1811_v41, %v3497_v5 }
 0x920   :  { %v1815_v38 = vmul.f32 0.5, %v1814_v24 }
 0x921   :  { %v1884_v61 = vmul.f32 %v3550_v32, %v1873_v28 }
 0x922   :  { %v1816_v49 = vsub.f32 1.5, %v1815_v38 }
 0x923   :  { %v3565_v57 = vadd.f32 %v3556_v40, %v1884_v61 }
 0x924   :  { %v1817_v58 = vmul.f32 %v2808_v52, %v1816_v49 }
 0x925   :  { %v1724_v4 = vpop.xlane.xlu1 %1723  ;;  %v1902_v2 = vpack.c.bf16 %v3565_v57, %v3562_v43 }
 0x926   :  { %v1734_v17 = vmul.f32 %v1724_v4, %v3012_v20  ;;  %v1821_v60 = vsel %vm1820_vm1, %v2808_v52, %v1817_v58 }
 0x927   :  { %2608 = vmatmul.msk.bf16.vlgmr.msra.gmra.mxu0 %vm257_vm9, %v1902_v2  ;;  %v1874_v0 = vmul.f32 %v1821_v60, %v3503_v16 }
 0x928   :  { %v3572_v5 = vsub.f32 %v3512_v48, %v1734_v17  ;;  %v1769_v19 = vpop.xlane.xlu2 %1768 }
 0x929   :  { %v1781_v23 = vmul.f32 %v1769_v19, %v3012_v20  ;;  %v1885_v36 = vmul.f32 %v3550_v32, %v1874_v0 }
 0x92a   :  { %v1750_v22 = vmul.f32 %v3572_v5, %v3572_v5 }
 0x92b   :  { %v1789_v51 = vadd.f32 1e-12, %v1781_v23  ;;  %v3592_v50 = vadd.f32 %v3556_v40, %v1885_v36 }
 0x92c   :  { %v1770_v12 = vsel %vm257_vm9, %v1750_v22, 0.0  ;;  %v3623_v22 = vld [vmem:[%s3961_s13] ss:$0 sm:$0xff] }
 0x92d   :  { %v1727_v25 = vpop.xlane.xlu0 %1726  ;;  %1771 = vadd.xlane.f32.xlu1 %v1770_v12  ;;  %v1763_v14 = vpop.xlane.xlu1 %1762  ;;  %2809 = vrsqrt.f32 %v1789_v51  ;;  %vm1848_vm11 = vweird.f32 %v1789_v51 }
 0x92e   :  { %v1735_v26 = vmul.f32 %v1727_v25, %v3012_v20  ;;  %v1779_v35 = vmul.f32 %v1763_v14, %v3012_v20  ;;  %v2642_v14 = vld [vmem:[%s3962_s14] sm:$0xff] }
 0x930   :  { %v3581_v48 = vsub.f32 %v3528_v39, %v1735_v26  ;;  %v1787_v33 = vadd.f32 1e-12, %v1779_v35 }
 0x932   :  { %2811 = vrsqrt.f32 %v1787_v33  ;;  %v1751_v21 = vmul.f32 %v3581_v48, %v3581_v48  ;;  %vm1828_vm4 = vweird.f32 %v1787_v33 }
 0x933   :  { %v2810_v53 = vpop.eup %2809 }
 0x934   :  { %v1773_v54 = vsel %vm257_vm9, %v1751_v21, 0.0  ;;  %v1843_v39 = vmul.f32 %v2810_v53, %v1789_v51  ;;  %vm1849_vm7 = vweird.f32 %v2810_v53  ;;  %v2643_v51 = vld [vmem:[%s3962_s14 + $0x8] sm:$0xff] }
 0x935   :  { %1774 = vadd.xlane.f32.xlu0 %v1773_v54  ;;  %v1766_v1 = vpop.xlane.xlu0 %1765  ;;  %vm1850_vm12 = vmor %vm1848_vm11, %vm1849_vm7 }
 0x936   :  { %v1780_v44 = vmul.f32 %v1766_v1, %v3012_v20  ;;  %v1844_v34 = vmul.f32 %v2810_v53, %v1843_v39 }
 0x938   :  { %v2812_v63 = vpop.eup %2811  ;;  %v1788_v55 = vadd.f32 1e-12, %v1780_v44  ;;  %v1845_v59 = vmul.f32 0.5, %v1844_v34 }
 0x939   :  { %v1823_v46 = vmul.f32 %v2812_v63, %v1787_v33  ;;  %vm1829_vm3 = vweird.f32 %v2812_v63 }
 0x93a   :  { %2813 = vrsqrt.f32 %v1788_v55  ;;  %vm1830_vm5 = vmor %vm1828_vm4, %vm1829_vm3  ;;  %v1846_v30 = vsub.f32 1.5, %v1845_v59  ;;  %vm1838_vm8 = vweird.f32 %v1788_v55 }
 0x93b   :  { %v1824_v47 = vmul.f32 %v2812_v63, %v1823_v46 }
 0x93c   :  { %v1847_v8 = vmul.f32 %v2810_v53, %v1846_v30 }
 0x93d   :  { %v1825_v6 = vmul.f32 0.5, %v1824_v47 }
 0x93e   :  { %v1851_v37 = vsel %vm1850_vm12, %v2810_v53, %v1847_v8 }
 0x93f   :  { %v1826_v42 = vsub.f32 1.5, %v1825_v6  ;;  %v1877_v61 = vmul.f32 %v1851_v37, %v3514_v18  ;;  %v2644_v18 = vld [vmem:[%s3962_s14 + $0x10] sm:$0xff] }
 0x940   :  { %v2814_v62 = vpop.eup %2813 }
 0x941   :  { %v1827_v10 = vmul.f32 %v2812_v63, %v1826_v42  ;;  %v1833_v29 = vmul.f32 %v2814_v62, %v1788_v55  ;;  %vm1839_vm6 = vweird.f32 %v2814_v62  ;;  %v1888_v2 = vmul.f32 %v3550_v32, %v1877_v61 }
 0x942   :  { %vm1840_vm10 = vmor %vm1838_vm8, %vm1839_vm6 }
 0x943   :  { %v1831_v13 = vsel %vm1830_vm5, %v2812_v63, %v1827_v10  ;;  %v1834_v56 = vmul.f32 %v2814_v62, %v1833_v29  ;;  %v3608_v17 = vadd.f32 %v3556_v40, %v1888_v2 }
 0x944   :  { %v1875_v7 = vmul.f32 %v1831_v13, %v3516_v15 }
 0x945   :  { %v1835_v3 = vmul.f32 0.5, %v1834_v56 }
 0x946   :  { %v1886_v31 = vmul.f32 %v3550_v32, %v1875_v7 }
 0x947   :  { %v1836_v27 = vsub.f32 1.5, %v1835_v3 }
 0x948   :  { %v3595_v16 = vadd.f32 %v3556_v40, %v1886_v31 }
 0x949   :  { %v1837_v9 = vmul.f32 %v2814_v62, %v1836_v27 }
 0x94a   :  { %v1903_v15 = vpack.c.bf16 %v3595_v16, %v3592_v50 }
 0x94b   :  { %v1841_v41 = vsel %vm1840_vm10, %v2814_v62, %v1837_v9 }
 0x94c   :  { %2609 = vmatmul.msk.bf16.gmra.mxu0 %vm257_vm9, %v1903_v15  ;;  %v1876_v28 = vmul.f32 %v1841_v41, %v3530_v45  ;;  %v2645_v45 = vld [vmem:[%s3962_s14 + $0x18] sm:$0xff] }
 0x94d   :  { %2095 = vmatpush.bf16.msra.mxu1 %v2645_v45 }
 0x94e   :  { %v1887_v4 = vmul.f32 %v3550_v32, %v1876_v28 }
 0x950   :  { %v3605_v52 = vadd.f32 %v3556_v40, %v1887_v4 }
 0x951   :  { %2096 = vmatpush.bf16.msra.mxu1 %v2644_v18 }
 0x952   :  { %v1904_v19 = vpack.c.bf16 %v3608_v17, %v3605_v52 }
 0x955   :  { %2097 = vmatpush.bf16.msra.mxu1 %v2643_v51 }
 0x959   :  { %2098 = vmatpush.bf16.msra.mxu1 %v2642_v14 }
 0x95c   :  { %2610 = vmatmul.msk.bf16.gmra.mxu0 %vm257_vm9, %v1904_v19 }
 0x9a0   :  { %v1772_v11 = vpop.xlane.xlu1 %1771 }
 0x9a1   :  { %v1782_v23 = vmul.f32 %v1772_v11, %v3012_v20 }
 0x9a3   :  { %v1790_v12 = vadd.f32 1e-12, %v1782_v23 }
 0x9a4   :  { %v1947_v24 = vpop.f32.mrf.mxu0 }
 0x9a5   :  { %2815 = vrsqrt.f32 %v1790_v12  ;;  %v1948_v25 = vadd.f32 %v3623_v22, %v1947_v24  ;;  %vm1858_vm14 = vweird.f32 %v1790_v12 }
 0x9a7   :  { %v1967_v26 = vmul.f32 %v1948_v25, %v1948_v25 }
 0x9a8   :  { %v1775_v35 = vpop.xlane.xlu0 %1774 }
 0x9a9   :  { %v1975_v33 = vmul.f32 %v1967_v26, %v1948_v25  ;;  %v1783_v38 = vmul.f32 %v1775_v35, %v3012_v20 }
 0x9ab   :  { %v2816_v21 = vpop.eup %2815  ;;  %v1983_v54 = vmul.f32 0.044715, %v1975_v33  ;;  %v1791_v49 = vadd.f32 1e-12, %v1783_v38 }
 0x9ac   :  { %v1853_v1 = vmul.f32 %v2816_v21, %v1790_v12  ;;  %v1949_v53 = vpop.f32.mrf.mxu0  ;;  %vm1859_vm13 = vweird.f32 %v2816_v21 }
 0x9ad   :  { %v1991_v44 = vadd.f32 %v1983_v54, %v1948_v25  ;;  %2817 = vrsqrt.f32 %v1791_v49  ;;  %v1950_v63 = vadd.f32 %v3623_v22, %v1949_v53  ;;  %vm1860_vm15 = vmor %vm1858_vm14, %vm1859_vm13  ;;  %vm1868_vm1 = vweird.f32 %v1791_v49 }
 0x9ae   :  { %v1854_v55 = vmul.f32 %v2816_v21, %v1853_v1 }
 0x9af   :  { %v1999_v58 = vmul.f32 0.7978846, %v1991_v44  ;;  %v1968_v39 = vmul.f32 %v1950_v63, %v1950_v63 }
 0x9b0   :  { %v1855_v46 = vmul.f32 0.5, %v1854_v55 }
 0x9b1   :  { %v1976_v47 = vmul.f32 %v1968_v39, %v1950_v63  ;;  %2819 = vtanh.f32 %v1999_v58 }
 0x9b2   :  { %v1856_v60 = vsub.f32 1.5, %v1855_v46 }
 0x9b3   :  { %v2818_v34 = vpop.eup %2817  ;;  %v1984_v6 = vmul.f32 0.044715, %v1976_v47 }
 0x9b4   :  { %v1857_v42 = vmul.f32 %v2816_v21, %v1856_v60  ;;  %v1863_v62 = vmul.f32 %v2818_v34, %v1791_v49  ;;  %vm1869_vm0 = vweird.f32 %v2818_v34 }
 0x9b5   :  { %v1992_v0 = vadd.f32 %v1984_v6, %v1950_v63  ;;  %vm1870_vm3 = vmor %vm1868_vm1, %vm1869_vm0 }
 0x9b6   :  { %v1864_v59 = vmul.f32 %v2818_v34, %v1863_v62  ;;  %v1861_v29 = vsel %vm1860_vm15, %v2816_v21, %v1857_v42 }
 0x9b7   :  { %v2000_v10 = vmul.f32 0.7978846, %v1992_v0  ;;  %v2820_v56 = vpop.eup %2819  ;;  %v1878_v36 = vmul.f32 %v1861_v29, %v3572_v5 }
 0x9b8   :  { %v1865_v13 = vmul.f32 0.5, %v1864_v59  ;;  %v2015_v30 = vadd.f32 1.0, %v2820_v56 }
 0x9b9   :  { %2821 = vtanh.f32 %v2000_v10  ;;  %v1889_v9 = vmul.f32 %v3550_v32, %v1878_v36 }
 0x9ba   :  { %v1866_v7 = vsub.f32 1.5, %v1865_v13  ;;  %v2023_v15 = vmul.f32 0.5, %v2015_v30 }
 0x9bb   :  { %v3639_v61 = vadd.f32 %v3556_v40, %v1889_v9 }
 0x9bc   :  { %v1867_v3 = vmul.f32 %v2818_v34, %v1866_v7  ;;  %v2031_v4 = vmul.f32 %v2023_v15, %v1948_v25  ;;  %v3657_v15 = vld [vmem:[%s3963_s15] ss:$0 sm:$0xff] }
 0x9be   :  { %v1871_v31 = vsel %vm1870_vm3, %v2818_v34, %v1867_v3 }
 0x9bf   :  { %v2822_v27 = vpop.eup %2821  ;;  %v1879_v8 = vmul.f32 %v1871_v31, %v3581_v48 }
 0x9c0   :  { %v2016_v41 = vadd.f32 1.0, %v2822_v27 }
 0x9c1   :  { %v1890_v37 = vmul.f32 %v3550_v32, %v1879_v8 }
 0x9c2   :  { %v2024_v28 = vmul.f32 0.5, %v2016_v41 }
 0x9c3   :  { %v3642_v5 = vadd.f32 %v3556_v40, %v1890_v37 }
 0x9c4   :  { %v2032_v2 = vmul.f32 %v2024_v28, %v1950_v63 }
 0x9c5   :  { %v1905_v19 = vpack.c.bf16 %v3642_v5, %v3639_v61 }
 0x9c6   :  { %v2039_v45 = vpack.c.bf16 %v2032_v2, %v2031_v4 }
 0x9c7   :  { %2611 = vmatmul.msk.bf16.gmra.mxu0 %vm257_vm9, %v1905_v19 }
 0x9c8   :  { %2628 = vmatmul.msk.bf16.vlgmr.msra.gmra.mxu1 %vm204_vm2, %v2039_v45 }
 0x9c9   :  { %v1952_v48 = vpop.f32.mrf.mxu0 }
 0x9ca   :  { %v1953_v32 = vadd.f32 %v3623_v22, %v1952_v48 }
 0x9cc   :  { %v1969_v18 = vmul.f32 %v1953_v32, %v1953_v32 }
 0x9ce   :  { %v1977_v11 = vmul.f32 %v1969_v18, %v1953_v32 }
 0x9d0   :  { %v1985_v23 = vmul.f32 0.044715, %v1977_v11 }
 0x9d1   :  { %v1954_v51 = vpop.f32.mrf.mxu0 }
 0x9d2   :  { %v1993_v12 = vadd.f32 %v1985_v23, %v1953_v32  ;;  %v1955_v40 = vadd.f32 %v3623_v22, %v1954_v51 }
 0x9d4   :  { %v2001_v24 = vmul.f32 0.7978846, %v1993_v12  ;;  %v1970_v25 = vmul.f32 %v1955_v40, %v1955_v40 }
 0x9d6   :  { %v1978_v14 = vmul.f32 %v1970_v25, %v1955_v40  ;;  %2823 = vtanh.f32 %v2001_v24 }
 0x9d8   :  { %v1986_v26 = vmul.f32 0.044715, %v1978_v14 }
 0x9d9   :  { %v1957_v35 = vpop.f32.mrf.mxu0 }
 0x9da   :  { %v1994_v33 = vadd.f32 %v1986_v26, %v1955_v40  ;;  %v1958_v38 = vadd.f32 %v3623_v22, %v1957_v35 }
 0x9dc   :  { %v2002_v21 = vmul.f32 0.7978846, %v1994_v33  ;;  %v1971_v54 = vmul.f32 %v1958_v38, %v1958_v38  ;;  %v2824_v49 = vpop.eup %2823 }
 0x9dd   :  { %v2017_v63 = vadd.f32 1.0, %v2824_v49 }
 0x9de   :  { %2825 = vtanh.f32 %v2002_v21  ;;  %v1979_v1 = vmul.f32 %v1971_v54, %v1958_v38 }
 0x9df   :  { %v2025_v34 = vmul.f32 0.5, %v2017_v63 }
 0x9e0   :  { %v1987_v53 = vmul.f32 0.044715, %v1979_v1 }
 0x9e1   :  { %v1959_v44 = vpop.f32.mrf.mxu0  ;;  %v2033_v0 = vmul.f32 %v2025_v34, %v1953_v32 }
 0x9e2   :  { %v1995_v55 = vadd.f32 %v1987_v53, %v1958_v38  ;;  %v1960_v58 = vadd.f32 %v3623_v22, %v1959_v44 }
 0x9e4   :  { %v2826_v39 = vpop.eup %2825  ;;  %v2003_v46 = vmul.f32 0.7978846, %v1995_v55  ;;  %v1972_v47 = vmul.f32 %v1960_v58, %v1960_v58 }
 0x9e5   :  { %v2018_v60 = vadd.f32 1.0, %v2826_v39 }
 0x9e6   :  { %v1980_v6 = vmul.f32 %v1972_v47, %v1960_v58  ;;  %2827 = vtanh.f32 %v2003_v46 }
 0x9e7   :  { %v2026_v42 = vmul.f32 0.5, %v2018_v60 }
 0x9e8   :  { %v1988_v62 = vmul.f32 0.044715, %v1980_v6 }
 0x9e9   :  { %v2034_v59 = vmul.f32 %v2026_v42, %v1955_v40 }
 0x9ea   :  { %v1996_v10 = vadd.f32 %v1988_v62, %v1960_v58 }
 0x9eb   :  { %v2040_v29 = vpack.c.bf16 %v2034_v59, %v2033_v0 }
 0x9ec   :  { %v2004_v13 = vmul.f32 0.7978846, %v1996_v10  ;;  %v2828_v56 = vpop.eup %2827 }
 0x9ed   :  { %2629 = vmatmul.msk.bf16.gmra.mxu1 %vm204_vm2, %v2040_v29  ;;  %v2019_v7 = vadd.f32 1.0, %v2828_v56 }
 0x9ee   :  { %2829 = vtanh.f32 %v2004_v13 }
 0x9ef   :  { %v2027_v3 = vmul.f32 0.5, %v2019_v7 }
 0x9f1   :  { %v2035_v27 = vmul.f32 %v2027_v3, %v1958_v38 }
 0x9f4   :  { %v2830_v36 = vpop.eup %2829 }
 0x9f5   :  { %v2020_v30 = vadd.f32 1.0, %v2830_v36 }
 0x9f7   :  { %v2028_v31 = vmul.f32 0.5, %v2020_v30 }
 0x9f9   :  { %v2036_v8 = vmul.f32 %v2028_v31, %v1960_v58 }
 0x9fb   :  { %v2041_v9 = vpack.c.bf16 %v2036_v8, %v2035_v27 }
 0x9fd   :  { %2630 = vmatmul.msk.bf16.gmra.mxu1 %vm204_vm2, %v2041_v9 }
 0xa44   :  { %v1962_v41 = vpop.f32.mrf.mxu0 }
 0xa45   :  { %v1963_v37 = vadd.f32 %v3623_v22, %v1962_v41  ;;  %v2100_v28 = vpop.f32.mrf.mxu1 }
 0xa46   :  { %v2101_v4 = vadd.f32 %v3657_v15, %v2100_v28 }
 0xa47   :  { %v1973_v2 = vmul.f32 %v1963_v37, %v1963_v37 }
 0xa48   :  { %v2120_v19 = vadd.f32 %v2101_v4, %v3562_v43 }
 0xa49   :  { %v1981_v45 = vmul.f32 %v1973_v2, %v1963_v37 }
 0xa4a   :  { %v2130_v48 = vsel %vm257_vm9, %v2120_v19, 0.0 }
 0xa4b   :  { %v1989_v32 = vmul.f32 0.044715, %v1981_v45  ;;  %2131 = vadd.xlane.f32.xlu2 %v2130_v48 }
 0xa4c   :  { %v1964_v18 = vpop.f32.mrf.mxu0 }
 0xa4d   :  { %v1997_v11 = vadd.f32 %v1989_v32, %v1963_v37  ;;  %v1965_v23 = vadd.f32 %v3623_v22, %v1964_v18  ;;  %v2102_v51 = vpop.f32.mrf.mxu1 }
 0xa4e   :  { %v2103_v12 = vadd.f32 %v3657_v15, %v2102_v51 }
 0xa4f   :  { %v2005_v40 = vmul.f32 0.7978846, %v1997_v11  ;;  %v1974_v24 = vmul.f32 %v1965_v23, %v1965_v23 }
 0xa50   :  { %v2121_v25 = vadd.f32 %v2103_v12, %v3565_v57 }
 0xa51   :  { %v1982_v14 = vmul.f32 %v1974_v24, %v1965_v23  ;;  %2831 = vtanh.f32 %v2005_v40 }
 0xa52   :  { %v2133_v26 = vsel %vm257_vm9, %v2121_v25, 0.0 }
 0xa53   :  { %v1990_v43 = vmul.f32 0.044715, %v1982_v14  ;;  %2134 = vadd.xlane.f32.xlu1 %v2133_v26 }
 0xa55   :  { %v1998_v35 = vadd.f32 %v1990_v43, %v1965_v23 }
 0xa57   :  { %v2006_v33 = vmul.f32 0.7978846, %v1998_v35  ;;  %v2832_v38 = vpop.eup %2831 }
 0xa58   :  { %v2021_v21 = vadd.f32 1.0, %v2832_v38 }
 0xa59   :  { %2833 = vtanh.f32 %v2006_v33 }
 0xa5a   :  { %v2029_v49 = vmul.f32 0.5, %v2021_v21 }
 0xa5c   :  { %v2037_v53 = vmul.f32 %v2029_v49, %v1963_v37 }
 0xa5f   :  { %v2834_v54 = vpop.eup %2833 }
 0xa60   :  { %v2022_v22 = vadd.f32 1.0, %v2834_v54 }
 0xa62   :  { %v2030_v1 = vmul.f32 0.5, %v2022_v22 }
 0xa64   :  { %v2038_v44 = vmul.f32 %v2030_v1, %v1965_v23 }
 0xa66   :  { %v2042_v63 = vpack.c.bf16 %v2038_v44, %v2037_v53 }
 0xa68   :  { %2631 = vmatmul.msk.bf16.gmra.mxu1 %vm204_vm2, %v2042_v63 }
 0xa6a   :  { %v2105_v57 = vpop.f32.mrf.mxu1 }
 0xa6b   :  { %v2106_v55 = vadd.f32 %v3657_v15, %v2105_v57 }
 0xa6d   :  { %v2122_v58 = vadd.f32 %v2106_v55, %v3592_v50 }
 0xa6f   :  { %v2136_v39 = vsel %vm257_vm9, %v2122_v58, 0.0 }
 0xa70   :  { %2137 = vadd.xlane.f32.xlu0 %v2136_v39 }
 0xa72   :  { %v2107_v46 = vpop.f32.mrf.mxu1 }
 0xa73   :  { %v2108_v47 = vadd.f32 %v3657_v15, %v2107_v46 }
 0xa75   :  { %v2123_v60 = vadd.f32 %v2108_v47, %v3595_v16 }
 0xa77   :  { %v2139_v34 = vsel %vm257_vm9, %v2123_v60, 0.0 }
 0xa78   :  { %2140 = vadd.xlane.f32.xlu2 %v2139_v34 }
 0xa7a   :  { %v2110_v6 = vpop.f32.mrf.mxu1 }
 0xa7b   :  { %v2111_v42 = vadd.f32 %v3657_v15, %v2110_v6 }
 0xa7d   :  { %v2124_v62 = vadd.f32 %v2111_v42, %v3605_v52 }
 0xa7f   :  { %v2142_v0 = vsel %vm257_vm9, %v2124_v62, 0.0 }
 0xa80   :  { %2143 = vadd.xlane.f32.xlu1 %v2142_v0 }
 0xa82   :  { %v2112_v50 = vpop.f32.mrf.mxu1 }
 0xa83   :  { %v2113_v59 = vadd.f32 %v3657_v15, %v2112_v50 }
 0xa85   :  { %v2125_v10 = vadd.f32 %v2113_v59, %v3608_v17 }
 0xa87   :  { %v2145_v29 = vsel %vm257_vm9, %v2125_v10, 0.0 }
 0xa88   :  { %2146 = vadd.xlane.f32.xlu0 %v2145_v29 }
 0xabe   :  { %v2132_v16 = vpop.xlane.xlu2 %2131 }
 0xabf   :  { %v2154_v13 = vmul.f32 %v2132_v16, %v3012_v20 }
 0xac1   :  { %v3681_v56 = vsub.f32 %v2120_v19, %v2154_v13 }
 0xac3   :  { %v2170_v7 = vmul.f32 %v3681_v56, %v3681_v56 }
 0xac5   :  { %v2178_v52 = vsel %vm257_vm9, %v2170_v7, 0.0 }
 0xac6   :  { %2179 = vadd.xlane.f32.xlu0 %v2178_v52  ;;  %v2135_v36 = vpop.xlane.xlu1 %2134 }
 0xac7   :  { %v2155_v17 = vmul.f32 %v2135_v36, %v3012_v20 }
 0xac9   :  { %v3690_v8 = vsub.f32 %v2121_v25, %v2155_v17 }
 0xacb   :  { %v2171_v45 = vmul.f32 %v3690_v8, %v3690_v8 }
 0xacd   :  { %v2181_v23 = vsel %vm257_vm9, %v2171_v45, 0.0 }
 0xae3   :  { %v2138_v9 = vpop.xlane.xlu0 %2137 }
 0xae4   :  { %v2156_v4 = vmul.f32 %v2138_v9, %v3012_v20 }
 0xae5   :  { %v2115_v30 = vpop.f32.mrf.mxu1 }
 0xae6   :  { %v2116_v3 = vadd.f32 %v3657_v15, %v2115_v30  ;;  %v3702_v32 = vsub.f32 %v2122_v58, %v2156_v4 }
 0xae8   :  { %v2126_v31 = vadd.f32 %v2116_v3, %v3639_v61  ;;  %v2172_v40 = vmul.f32 %v3702_v32, %v3702_v32 }
 0xaea   :  { %v2148_v27 = vsel %vm257_vm9, %v2126_v31, 0.0  ;;  %v2184_v24 = vsel %vm257_vm9, %v2172_v40, 0.0 }
 0xaeb   :  { %v2141_v41 = vpop.xlane.xlu2 %2140  ;;  %2149 = vadd.xlane.f32.xlu2 %v2148_v27 }
 0xaec   :  { %v2157_v37 = vmul.f32 %v2141_v41, %v3012_v20 }
 0xaed   :  { %v2117_v28 = vpop.f32.mrf.mxu1 }
 0xaee   :  { %v3694_v2 = vsub.f32 %v2123_v60, %v2157_v37  ;;  %v2118_v19 = vadd.f32 %v3657_v15, %v2117_v28 }
 0xaf0   :  { %v2173_v61 = vmul.f32 %v3694_v2, %v3694_v2  ;;  %v2127_v48 = vadd.f32 %v2118_v19, %v3642_v5 }
 0xaf2   :  { %v2187_v18 = vsel %vm257_vm9, %v2173_v61, 0.0  ;;  %v2151_v11 = vsel %vm257_vm9, %v2127_v48, 0.0 }
 0xaf3   :  { %2188 = vadd.xlane.f32.xlu0 %v2187_v18  ;;  %2152 = vadd.xlane.f32.xlu1 %v2151_v11  ;;  %v2144_v51 = vpop.xlane.xlu1 %2143 }
 0xaf4   :  { %2182 = vadd.xlane.f32.xlu2 %v2181_v23  ;;  %v2158_v15 = vmul.f32 %v2144_v51, %v3012_v20 }
 0xaf6   :  { %v3708_v12 = vsub.f32 %v2124_v62, %v2158_v15 }
 0xaf8   :  { %v2174_v5 = vmul.f32 %v3708_v12, %v3708_v12 }
 0xafa   :  { %v2190_v25 = vsel %vm257_vm9, %v2174_v5, 0.0 }
 0xafb   :  { %v2147_v14 = vpop.xlane.xlu0 %2146  ;;  %2185 = vadd.xlane.f32.xlu1 %v2184_v24 }
 0xafc   :  { %v2159_v26 = vmul.f32 %v2147_v14, %v3012_v20  ;;  %2191 = vadd.xlane.f32.xlu2 %v2190_v25 }
 0xafe   :  { %v3717_v43 = vsub.f32 %v2125_v10, %v2159_v26 }
 0xb00   :  { %v2175_v35 = vmul.f32 %v3717_v43, %v3717_v43 }
 0xb02   :  { %v2193_v33 = vsel %vm257_vm9, %v2175_v35, 0.0 }
 0xb03   :  { %2194 = vadd.xlane.f32.xlu1 %v2193_v33 }
 0xb39   :  { %v2180_v38 = vpop.xlane.xlu0 %2179 }
 0xb3a   :  { %v2202_v21 = vmul.f32 %v2180_v38, %v3012_v20 }
 0xb3c   :  { %v3723_v22 = vadd.f32 1e-12, %v2202_v21 }
 0xb3e   :  { %2835 = vrsqrt.f32 %v3723_v22  ;;  %vm2224_vm8 = vweird.f32 %v3723_v22 }
 0xb44   :  { %v3735_v47 = vpop.eup %2835 }
 0xb45   :  { %v2219_v62 = vmul.f32 %v3735_v47, %v3723_v22  ;;  %vm2225_vm5 = vweird.f32 %v3735_v47 }
 0xb46   :  { %vm2226_vm10 = vmor %vm2224_vm8, %vm2225_vm5  ;;  %vm2337_vm8 = vcmask 1041409  }
 0xb47   :  { %v2220_v29 = vmul.f32 %v3735_v47, %v2219_v62 }
 0xb49   :  { %v2221_v17 = vmul.f32 0.5, %v2220_v29 }
 0xb4b   :  { %v2222_v28 = vsub.f32 1.5, %v2221_v17 }
 0xb4d   :  { %v2223_v51 = vmul.f32 %v3735_v47, %v2222_v28 }
 0xb4f   :  { %v2227_v26 = vsel %vm2226_vm10, %v3735_v47, %v2223_v51  ;;  %v3780_v47 = vld [vmem:[%s3965_s17] ss:$0 sm:$0xff]  ;;  %vm2340_vm10 = vcmask 1042434   ;;  %s2885_s17 = smov 32  }
 0xb5e   :  { %v2150_v54 = vpop.xlane.xlu2 %2149 }
 0xb5f   :  { %v2160_v49 = vmul.f32 %v2150_v54, %v3012_v20 }
 0xb61   :  { %v3726_v1 = vsub.f32 %v2126_v31, %v2160_v49 }
 0xb63   :  { %v2176_v53 = vmul.f32 %v3726_v1, %v3726_v1 }
 0xb65   :  { %v2196_v44 = vsel %vm257_vm9, %v2176_v53, 0.0  ;;  %v3770_v53 = vld [vmem:[%s3964_s16] ss:$0 sm:$0xff] }
 0xb66   :  { %v2189_v63 = vpop.xlane.xlu0 %2188  ;;  %2197 = vadd.xlane.f32.xlu0 %v2196_v44  ;;  %v2153_v57 = vpop.xlane.xlu1 %2152  ;;  %v2298_v44 = vmul.f32 %v2227_v26, %v3681_v56 }
 0xb67   :  { %v2205_v55 = vmul.f32 %v2189_v63, %v3012_v20  ;;  %v2183_v58 = vpop.xlane.xlu2 %2182  ;;  %v2161_v39 = vmul.f32 %v2153_v57, %v3012_v20 }
 0xb68   :  { %v2203_v46 = vmul.f32 %v2183_v58, %v3012_v20  ;;  %v2309_v56 = vmul.f32 %v3770_v53, %v2298_v44 }
 0xb69   :  { %v3737_v60 = vadd.f32 1e-12, %v2205_v55  ;;  %v3739_v34 = vsub.f32 %v2127_v48, %v2161_v39 }
 0xb6a   :  { %v2211_v6 = vadd.f32 1e-12, %v2203_v46 }
 0xb6b   :  { %2837 = vrsqrt.f32 %v3737_v60  ;;  %v2177_v42 = vmul.f32 %v3739_v34, %v3739_v34  ;;  %vm2254_vm15 = vweird.f32 %v3737_v60 }
 0xb6c   :  { %2839 = vrsqrt.f32 %v2211_v6  ;;  %vm2234_vm6 = vweird.f32 %v2211_v6 }
 0xb6d   :  { %v2199_v0 = vsel %vm257_vm9, %v2177_v42, 0.0 }
 0xb6e   :  { %2200 = vadd.xlane.f32.xlu2 %v2199_v0  ;;  %v2186_v50 = vpop.xlane.xlu1 %2185 }
 0xb6f   :  { %v2192_v59 = vpop.xlane.xlu2 %2191  ;;  %v2204_v10 = vmul.f32 %v2186_v50, %v3012_v20  ;;  %v3790_v50 = vadd.f32 %v3780_v47, %v2309_v56 }
 0xb70   :  { %v2206_v16 = vmul.f32 %v2192_v59, %v3012_v20 }
 0xb71   :  { %v3750_v13 = vpop.eup %2837  ;;  %v2212_v7 = vadd.f32 1e-12, %v2204_v10  ;;  %v2375_v44 = vrot.slane %v3790_v50, 2  ;;  %v2392_v56 = vrot.slane %v3790_v50, 3 }
 0xb72   :  { %v2840_v52 = vpop.eup %2839  ;;  %v2249_v36 = vmul.f32 %v3750_v13, %v3737_v60  ;;  %v3754_v30 = vadd.f32 1e-12, %v2206_v16  ;;  %vm2255_vm12 = vweird.f32 %v3750_v13 }
 0xb73   :  { %v2229_v3 = vmul.f32 %v2840_v52, %v2211_v6  ;;  %2841 = vrsqrt.f32 %v2212_v7  ;;  %vm2235_vm4 = vweird.f32 %v2840_v52  ;;  %vm2244_vm13 = vweird.f32 %v2212_v7  ;;  %vm2256_vm0 = vmor %vm2254_vm15, %vm2255_vm12 }
 0xb74   :  { %2843 = vrsqrt.f32 %v3754_v30  ;;  %v2250_v27 = vmul.f32 %v3750_v13, %v2249_v36  ;;  %vm2236_vm7 = vmor %vm2234_vm6, %vm2235_vm4  ;;  %vm2264_vm3 = vweird.f32 %v3754_v30  ;;  %v2409_v36 = vrot.slane %v3790_v50, 4 }
 0xb75   :  { %v2230_v31 = vmul.f32 %v2840_v52, %v2229_v3  ;;  %vm2346_vm12 = vcmask 1044484  }
 0xb76   :  { %v2195_v9 = vpop.xlane.xlu1 %2194  ;;  %v2251_v48 = vmul.f32 0.5, %v2250_v27 }
 0xb77   :  { %v2231_v41 = vmul.f32 0.5, %v2230_v31  ;;  %v2207_v37 = vmul.f32 %v2195_v9, %v3012_v20 }
 0xb78   :  { %v2252_v5 = vsub.f32 1.5, %v2251_v48 }
 0xb79   :  { %v2842_v4 = vpop.eup %2841  ;;  %v2232_v19 = vsub.f32 1.5, %v2231_v41  ;;  %v2215_v45 = vadd.f32 1e-12, %v2207_v37 }
 0xb7a   :  { %v2844_v61 = vpop.eup %2843  ;;  %v2239_v18 = vmul.f32 %v2842_v4, %v2212_v7  ;;  %vm2245_vm11 = vweird.f32 %v2842_v4  ;;  %v2253_v21 = vmul.f32 %v3750_v13, %v2252_v5 }
 0xb7b   :  { %v2233_v11 = vmul.f32 %v2840_v52, %v2232_v19  ;;  %v2259_v23 = vmul.f32 %v2844_v61, %v3754_v30  ;;  %2845 = vrsqrt.f32 %v2215_v45  ;;  %vm2246_vm14 = vmor %vm2244_vm13, %vm2245_vm11  ;;  %vm2265_vm1 = vweird.f32 %v2844_v61 }
 0xb7c   :  { %v2240_v15 = vmul.f32 %v2842_v4, %v2239_v18  ;;  %v2257_v55 = vsel %vm2256_vm0, %v3750_v13, %v2253_v21  ;;  %vm2266_vm5 = vmor %vm2264_vm3, %vm2265_vm1  ;;  %vm2274_vm6 = vweird.f32 %v2215_v45  ;;  %vm2343_vm11 = vcmask 1043459  }
 0xb7d   :  { %v2260_v40 = vmul.f32 %v2844_v61, %v2259_v23  ;;  %v2237_v24 = vsel %vm2236_vm7, %v2840_v52, %v2233_v11  ;;  %v2301_v6 = vmul.f32 %v2257_v55, %v3694_v2  ;;  %vm2349_vm13 = vcmask 1045509  }
 0xb7e   :  { %v2241_v25 = vmul.f32 0.5, %v2240_v15  ;;  %v2299_v38 = vmul.f32 %v2237_v24, %v3690_v8  ;;  %v2458_v55 = vrot.slane %v3790_v50, 7 }
 0xb7f   :  { %v2261_v14 = vmul.f32 0.5, %v2260_v40  ;;  %v2312_v10 = vmul.f32 %v3770_v53, %v2301_v6 }
 0xb80   :  { %v2242_v35 = vsub.f32 1.5, %v2241_v25  ;;  %v2310_v8 = vmul.f32 %v3770_v53, %v2299_v38 }
 0xb81   :  { %v2846_v33 = vpop.eup %2845  ;;  %v2262_v54 = vsub.f32 1.5, %v2261_v14  ;;  %v3803_v30 = vadd.f32 %v3780_v47, %v2312_v10 }
 0xb82   :  { %v2243_v49 = vmul.f32 %v2842_v4, %v2242_v35  ;;  %v2269_v22 = vmul.f32 %v2846_v33, %v2215_v45  ;;  %vm2275_vm4 = vweird.f32 %v2846_v33  ;;  %v3786_v42 = vadd.f32 %v3780_v47, %v2310_v8 }
 0xb83   :  { %v2263_v58 = vmul.f32 %v2844_v61, %v2262_v54  ;;  %vm2276_vm7 = vmor %vm2274_vm6, %vm2275_vm4  ;;  %v2414_v9 = vrot.slane %v3803_v30, 1  ;;  %v2342_v45 = vrot.slane %v3803_v30, 5  ;;  %v2362_v10 = vrot.slane %v3803_v30, 6 }
 0xb84   :  { %v2247_v63 = vsel %vm2246_vm14, %v2842_v4, %v2243_v49  ;;  %v2270_v57 = vmul.f32 %v2846_v33, %v2269_v22  ;;  %v2410_v16 = vrot.slane %v3786_v42, 3  ;;  %v2336_v7 = vrot.slane %v3786_v42, 7 }
 0xb85   :  { %v2300_v39 = vmul.f32 %v2247_v63, %v3702_v32  ;;  %v2267_v62 = vsel %vm2266_vm5, %v2844_v61, %v2263_v58  ;;  %v2424_v22 = vrot.slane %v3790_v50, 5  ;;  %v2358_v63 = vrot.slane %v3790_v50, 1 }
 0xb86   :  { %v2271_v46 = vmul.f32 0.5, %v2270_v57  ;;  %v2302_v29 = vmul.f32 %v2267_v62, %v3708_v12  ;;  %v2411_v12 = vsel %vm2337_vm8, %v2410_v16, %v2409_v36  ;;  %v2338_v31 = vsel %vm2337_vm8, %v2336_v7, %v3790_v50 }
 0xb87   :  { %v2311_v32 = vmul.f32 %v3770_v53, %v2300_v39  ;;  %v2441_v57 = vrot.slane %v3790_v50, 6  ;;  %v2425_v58 = vrot.slane %v3786_v42, 4  ;;  %v2376_v39 = vrot.slane %v3786_v42, 1 }
 0xb88   :  { %v2272_v60 = vsub.f32 1.5, %v2271_v46  ;;  %v2313_v3 = vmul.f32 %v3770_v53, %v2302_v29  ;;  %v2442_v46 = vrot.slane %v3786_v42, 5  ;;  %v2429_v62 = vrot.slane %v3803_v30, 2 }
 0xb89   :  { %v3797_v13 = vadd.f32 %v3780_v47, %v2311_v32  ;;  %v2379_v32 = vrot.slane %v3803_v30, 7  ;;  %v2459_v29 = vrot.slane %v3786_v42, 6  ;;  %v2359_v16 = vsel %vm2337_vm8, %v3786_v42, %v2358_v63 }
 0xb8a   :  { %v2273_v0 = vmul.f32 %v2846_v33, %v2272_v60  ;;  %v3814_v27 = vadd.f32 %v3780_v47, %v2313_v3  ;;  %v2393_v7 = vrot.slane %v3786_v42, 2  ;;  %v2426_v36 = vsel %vm2337_vm8, %v2425_v58, %v2424_v22 }
 0xb8b   :  { %v2412_v17 = vrot.slane %v3797_v13, 2  ;;  %v2339_v4 = vrot.slane %v3797_v13, 6  ;;  %v2360_v50 = vrot.slane %v3797_v13, 7  ;;  %v2443_v3 = vsel %vm2337_vm8, %v2442_v46, %v2441_v57 }
 0xb8c   :  { %v2277_v59 = vsel %vm2276_vm7, %v2846_v33, %v2273_v0  ;;  %v2345_v11 = vrot.slane %v3814_v27, 4  ;;  %vm2352_vm5 = vcmask 1046534   ;;  %vm2355_vm6 = vcmask 1047559  }
 0xb8d   :  { %v2303_v2 = vmul.f32 %v2277_v59, %v3717_v43  ;;  %v2413_v41 = vsel %vm2340_vm10, %v2412_v17, %v2411_v12  ;;  %v2341_v18 = vsel %vm2340_vm10, %v2339_v4, %v2338_v31  ;;  %v2427_v59 = vrot.slane %v3797_v13, 3 }
 0xb8e   :  { %v2415_v28 = vsel %vm2343_vm11, %v2414_v9, %v2413_v41  ;;  %v2344_v23 = vsel %vm2343_vm11, %v2342_v45, %v2341_v18  ;;  %v2446_v31 = vrot.slane %v3803_v30, 3  ;;  %v2460_v41 = vsel %vm2337_vm8, %v2459_v29, %v2458_v55 }
 0xb8f   :  { %v2314_v52 = vmul.f32 %v3770_v53, %v2303_v2  ;;  %v2416_v19 = vsel %vm2346_vm12, %v3814_v27, %v2415_v28  ;;  %v2347_v51 = vsel %vm2346_vm12, %v2345_v11, %v2344_v23  ;;  %v2428_v42 = vsel %vm2340_vm10, %v2427_v59, %v2426_v36 }
 0xb90   :  { %v2361_v4 = vsel %vm2340_vm10, %v2360_v50, %v2359_v16  ;;  %v2431_v45 = vrot.slane %v3814_v27, 1  ;;  %v2381_v18 = vrot.slane %v3814_v27, 6  ;;  %v2444_v11 = vrot.slane %v3797_v13, 4 }
 0xb91   :  { %v3808_v43 = vadd.f32 %v3780_v47, %v2314_v52  ;;  %v2448_v50 = vrot.slane %v3814_v27, 2  ;;  %vm2477_vm7 = vcmask 785408  }
 0xb93   :  { %v2417_v37 = vrot.slane %v3808_v43, 7  ;;  %v2348_v61 = vrot.slane %v3808_v43, 3  ;;  %v2467_v36 = vrot.slane %v3808_v43, 2 }
 0xb95   :  { %v3826_v48 = vsel %vm2349_vm13, %v2417_v37, %v2416_v19  ;;  %v3833_v15 = vsel %vm2349_vm13, %v2348_v61, %v2347_v51  ;;  %v2463_v37 = vrot.slane %v3803_v30, 4  ;;  %v2394_v19 = vsel %vm2337_vm8, %v2393_v7, %v2392_v56 }
 0xb96   :  { %v2430_v51 = vsel %vm2343_vm11, %v2429_v62, %v2428_v42  ;;  %v2450_v7 = vrot.slane %v3808_v43, 1  ;;  %v2398_v42 = vrot.slane %v3814_v27, 7 }
 0xb97   :  { %v2432_v22 = vsel %vm2346_vm12, %v2431_v45, %v2430_v51 }
 0xb98   :  { %v2433_v55 = vsel %vm2349_vm13, %v3808_v43, %v2432_v22 }
 0xbd9   :  { %v2198_v40 = vpop.xlane.xlu0 %2197 }
 0xbda   :  { %v2208_v5 = vmul.f32 %v2198_v40, %v3012_v20  ;;  %v2364_v40 = vrot.slane %v3814_v27, 5 }
 0xbdc   :  { %v2216_v24 = vadd.f32 1e-12, %v2208_v5 }
 0xbde   :  { %2847 = vrsqrt.f32 %v2216_v24  ;;  %vm2284_vm15 = vweird.f32 %v2216_v24 }
 0xbe1   :  { %v2201_v25 = vpop.xlane.xlu2 %2200 }
 0xbe2   :  { %v2209_v14 = vmul.f32 %v2201_v25, %v3012_v20  ;;  %v2363_v25 = vsel %vm2343_vm11, %v2362_v10, %v2361_v4 }
 0xbe4   :  { %v2848_v26 = vpop.eup %2847  ;;  %v2217_v35 = vadd.f32 1e-12, %v2209_v14  ;;  %v2461_v14 = vrot.slane %v3797_v13, 5 }
 0xbe5   :  { %v2279_v33 = vmul.f32 %v2848_v26, %v2216_v24  ;;  %vm2285_vm14 = vweird.f32 %v2848_v26 }
 0xbe6   :  { %2849 = vrsqrt.f32 %v2217_v35  ;;  %vm2286_vm0 = vmor %vm2284_vm15, %vm2285_vm14  ;;  %vm2294_vm3 = vweird.f32 %v2217_v35 }
 0xbe7   :  { %v2280_v38 = vmul.f32 %v2848_v26, %v2279_v33 }
 0xbe9   :  { %v2281_v21 = vmul.f32 0.5, %v2280_v38 }
 0xbeb   :  { %v2282_v54 = vsub.f32 1.5, %v2281_v21 }
 0xbec   :  { %v2850_v49 = vpop.eup %2849 }
 0xbed   :  { %v2283_v8 = vmul.f32 %v2848_v26, %v2282_v54  ;;  %v2289_v20 = vmul.f32 %v2850_v49, %v2217_v35  ;;  %vm2295_vm1 = vweird.f32 %v2850_v49  ;;  %v2366_v35 = vrot.slane %v3808_v43, 4 }
 0xbee   :  { %vm2296_vm4 = vmor %vm2294_vm3, %vm2295_vm1 }
 0xbef   :  { %v2287_v60 = vsel %vm2286_vm0, %v2848_v26, %v2283_v8  ;;  %v2290_v6 = vmul.f32 %v2850_v49, %v2289_v20  ;;  %v2383_v26 = vrot.slane %v3808_v43, 5  ;;  %v2365_v8 = vsel %vm2346_vm12, %v2364_v40, %v2363_v25 }
 0xbf0   :  { %v2304_v0 = vmul.f32 %v2287_v60, %v3726_v1  ;;  %v2377_v1 = vsel %vm2337_vm8, %v2376_v39, %v2375_v44  ;;  %v2395_v20 = vrot.slane %v3797_v13, 1  ;;  %v2367_v39 = vsel %vm2349_vm13, %v2366_v35, %v2365_v8 }
 0xbf1   :  { %v2291_v2 = vmul.f32 0.5, %v2290_v6  ;;  %v2378_v17 = vsel %vm2340_vm10, %v3797_v13, %v2377_v1  ;;  %v2465_v1 = vrot.slane %v3814_v27, 3 }
 0xbf2   :  { %v2315_v52 = vmul.f32 %v3770_v53, %v2304_v0  ;;  %v2380_v61 = vsel %vm2343_vm11, %v2379_v32, %v2378_v17  ;;  %v2396_v10 = vsel %vm2340_vm10, %v2395_v20, %v2394_v19  ;;  %v2400_v17 = vrot.slane %v3808_v43, 6 }
 0xbf3   :  { %v2292_v12 = vsub.f32 1.5, %v2291_v2 }
 0xbf4   :  { %v3864_v9 = vadd.f32 %v3780_v47, %v2315_v52 }
 0xbf5   :  { %v2293_v28 = vmul.f32 %v2850_v49, %v2292_v12  ;;  %v2397_v12 = vsel %vm2343_vm11, %v3803_v30, %v2396_v10 }
 0xbf6   :  { %v2419_v5 = vrot.slane %v3864_v9, 6  ;;  %v2351_v38 = vrot.slane %v3864_v9, 2  ;;  %v2434_v54 = vrot.slane %v3864_v9, 7  ;;  %v2385_v44 = vrot.slane %v3864_v9, 4 }
 0xbf7   :  { %v2297_v23 = vsel %vm2296_vm4, %v2850_v49, %v2293_v28  ;;  %v2445_v49 = vsel %vm2340_vm10, %v2444_v11, %v2443_v3  ;;  %v2368_v63 = vrot.slane %v3864_v9, 3  ;;  %v2469_v3 = vrot.slane %v3864_v9, 1 }
 0xbf8   :  { %v2305_v24 = vmul.f32 %v2297_v23, %v3739_v34  ;;  %v2420_v33 = vsel %vm2352_vm5, %v2419_v5, %v3826_v48  ;;  %v2382_v34 = vsel %vm2346_vm12, %v2381_v18, %v2380_v61  ;;  %v2353_v57 = vsel %vm2352_vm5, %v2351_v38, %v3833_v15 }
 0xbf9   :  { %v2384_v58 = vsel %vm2349_vm13, %v2383_v26, %v2382_v34  ;;  %v2435_v46 = vsel %vm2352_vm5, %v2434_v54, %v2433_v55  ;;  %v2369_v6 = vsel %vm2352_vm5, %v2368_v63, %v2367_v39  ;;  %v2447_v29 = vsel %vm2343_vm11, %v2446_v31, %v2445_v49 }
 0xbfa   :  { %v2316_v21 = vmul.f32 %v3770_v53, %v2305_v24  ;;  %v2462_v53 = vsel %vm2340_vm10, %v2461_v14, %v2460_v41  ;;  %v2402_v41 = vrot.slane %v3864_v9, 5  ;;  %v2449_v28 = vsel %vm2346_vm12, %v2448_v50, %v2447_v29 }
 0xbfb   :  { %v2464_v52 = vsel %vm2343_vm11, %v2463_v37, %v2462_v53  ;;  %v2451_v19 = vsel %vm2349_vm13, %v2450_v7, %v2449_v28  ;;  %v2399_v61 = vsel %vm2346_vm12, %v2398_v42, %v2397_v12 }
 0xbfc   :  { %v2327_v48 = vadd.f32 %v3780_v47, %v2316_v21  ;;  %v2386_v47 = vsel %vm2352_vm5, %v2385_v44, %v2384_v58  ;;  %v2466_v37 = vsel %vm2346_vm12, %v2465_v1, %v2464_v52  ;;  %v2452_v30 = vsel %vm2352_vm5, %v3864_v9, %v2451_v19 }
 0xbfd   :  { %v2468_v45 = vsel %vm2349_vm13, %v2467_v36, %v2466_v37  ;;  %v2401_v27 = vsel %vm2349_vm13, %v2400_v17, %v2399_v61 }
 0xbfe   :  { %v2436_v56 = vrot.slane %v2327_v48, 6  ;;  %v2387_v15 = vrot.slane %v2327_v48, 3  ;;  %v2370_v60 = vrot.slane %v2327_v48, 2  ;;  %v2421_v62 = vrot.slane %v2327_v48, 5 }
 0xbff   :  { %v2354_v32 = vrot.slane %v2327_v48, 1  ;;  %v2453_v31 = vrot.slane %v2327_v48, 7  ;;  %v2404_v4 = vrot.slane %v2327_v48, 4  ;;  %v2470_v43 = vsel %vm2352_vm5, %v2469_v3, %v2468_v45 }
 0xc00   :  { %v2437_v13 = vsel %vm2355_vm6, %v2436_v56, %v2435_v46  ;;  %v2388_v0 = vsel %vm2355_vm6, %v2387_v15, %v2386_v47  ;;  %v2371_v59 = vsel %vm2355_vm6, %v2370_v60, %v2369_v6  ;;  %v2422_v2 = vsel %vm2355_vm6, %v2421_v62, %v2420_v33 }
 0xc01   :  { %2438 = vrot.lane.b32.xlu0 %v2437_v13, %s2885_s17  ;;  %2389 = vrot.lane.b32.xlu2 %v2388_v0, %s2880_s7  ;;  %v2356_v16 = vsel %vm2355_vm6, %v2354_v32, %v2353_v57  ;;  %v2454_v18 = vsel %vm2355_vm6, %v2453_v31, %v2452_v30  ;;  %v2471_v11 = vsel %vm2355_vm6, %v2327_v48, %v2470_v43 }
 0xc02   :  { %2372 = vrot.lane.b32.xlu1 %v2371_v59, %s2885_s17  ;;  %v2403_v23 = vsel %vm2352_vm5, %v2402_v41, %v2401_v27 }
 0xc03   :  { %v2405_v51 = vsel %vm2355_vm6, %v2404_v4, %v2403_v23 }
 0xc09   :  { %2455 = vrot.lane.b32.xlu0 %v2454_v18, %s2880_s7  ;;  %2472 = vrot.lane.b32.xlu2 %v2471_v11, %s2879_s19 }
 0xc0a   :  { %2406 = vrot.lane.b32.xlu1 %v2405_v51, %s2879_s19 }
 0xc5b   :  { %v2390_v40 = vpop.permute.xlu2 %2389 }
 0xc63   :  { %v2473_v26 = vpop.permute.xlu2 %2472 }
 0xc73   :  { %v2439_v9 = vpop.permute.xlu0 %2438 }
 0xc74   :  { %v2373_v5 = vpop.permute.xlu1 %2372  ;;  %v2479_v25 = vsel %vm257_vm9, %v2422_v2, %v2439_v9 }
 0xc75   :  { %v2475_v24 = vsel %vm257_vm9, %v2356_v16, %v2373_v5 }
 0xc76   :  { %v2476_v38 = vsel %vm204_vm2, %v2475_v24, %v2390_v40 }
 0xc7b   :  { %v2456_v14 = vpop.permute.xlu0 %2455 }
 0xc7c   :  { %v2480_v35 = vsel %vm204_vm2, %v2479_v25, %v2456_v14  ;;  %v2407_v33 = vpop.permute.xlu1 %2406 }
 0xc7d   :  { %v2481_v21 = vsel %vm2477_vm7, %v2480_v35, %v2473_v26  ;;  %v2478_v54 = vsel %vm2477_vm7, %v2476_v38, %v2407_v33 }
 0xc7e   :  { %2483 = vst [vmem:[#allocation2 + $0x8] sm:$0xff] %v2481_v21 }
 0xc7f   :  { %2482 = vst [vmem:[#allocation2] sm:$0xff] %v2478_v54 }
 0xc80   :  { %2494 = dma.vmem_to_hbm [thread:$0]  %s2490_s8, 256, %s2492_s6, [#allocation3]  }
 0xc81   :  { %2875 = dma.done.wait [#allocation3], 256  }
 0xc82   :  { %2876 = vsyncadd [#allocation3], 4294967040 }
 0xc83   :  { %2499 = vsyncpa [#allocation3], 1 }

</bundles_post_ra>
